<compile_context>
chip_gen: v6e
topology: v6e:2x2x1
jax: 0.10.0
libtpu: 0.0.40
codegen_flags: <defaults>
</compile_context>

<pallas_src>
import jax
import jax.numpy as jnp
from jax import lax
from jax.experimental import pallas as pl
from jax.experimental.pallas import tpu as pltpu

INPUT_SIZE = 3
HIDDEN = 64
NUM_LAYERS = 2          # hard-wired: layer-1 (input->H) and layer-2 (H->H) run in one kernel
OUT_PAD = 128           # lane-dense padded width for the linear head output


def _lstm_predictor_kernel(z1_ref,            # (T, B, 4H) f32  precomputed x@W_ih1 + b1 (permuted gates)
                           w_hh1_ref,         # (H, 4H)  bf16   layer-1 recurrent weight
                           w_ih2_ref,         # (H, 4H)  bf16   layer-2 input weight
                           w_hh2_ref,         # (H, 4H)  bf16   layer-2 recurrent weight
                           b2_ref,            # (1, 4H)  f32    layer-2 fused bias
                           w_out_ref,         # (H, OUT_PAD) bf16 (zero-padded head weight)
                           b_out_ref,         # (1, OUT_PAD) f32
                           out_ref):          # (B, OUT_PAD) f32
    T, B, _ = z1_ref.shape
    H = HIDDEN

    # Hoisted loads / broadcasts (JAX does not CSE broadcast_in_dim -> do it once).
    w_hh1 = w_hh1_ref[...]                                     # (H, 4H)  bf16
    w_ih2 = w_ih2_ref[...]                                     # (H, 4H)  bf16
    w_hh2 = w_hh2_ref[...]                                     # (H, 4H)  bf16
    b2 = jnp.broadcast_to(b2_ref[...], (B, 4 * H))             # (B, 4H)  f32

    # Gate order inside the 4H axis is [f, i, o, g] (pre-permuted in the wrapper).
    # Lane mask selects the g block (lanes 3H:4H) -> tanh; everything else -> sigmoid.
    lane = lax.broadcasted_iota(jnp.int32, (B, 4 * H), 1)
    g_mask = lane >= 3 * H

    def lstm_gates(z, c_prev):
        # Single EUP pass: sigmoid(x) = 0.5*tanh(x/2) + 0.5, tanh only where g_mask.
        zz = jnp.where(g_mask, z, 0.5 * z)
        t = jnp.tanh(zz)
        a = jnp.where(g_mask, t, 0.5 * t + 0.5)
        f_g = a[:, 0:H]
        i_g = a[:, H:2 * H]
        o_g = a[:, 2 * H:3 * H]
        g_g = a[:, 3 * H:4 * H]
        c_new = f_g * c_prev + i_g * g_g
        h_new = o_g * jnp.tanh(c_new)
        return h_new, c_new

    h1 = jnp.zeros((B, H), jnp.float32)
    c1 = jnp.zeros((B, H), jnp.float32)
    h2 = jnp.zeros((B, H), jnp.float32)
    c2 = jnp.zeros((B, H), jnp.float32)

    # Fully unrolled at trace time (T is a static constant): static z1_pre[t] slices and an
    # SSA dependence graph where dot(h2_{t-1}, W_hh2) is independent of layer-1(t), letting
    # the VLIW scheduler overlap the two MXU->EUP->VPU chains.
    for t in range(T):
        # ---- layer-2 recurrent partial: depends only on h2_{t-1}, overlaps layer-1(t) ----
        z2_rec = jnp.dot(h2.astype(jnp.bfloat16), w_hh2,
                         preferred_element_type=jnp.float32)

        # ---- layer 1: only the recurrent matmul remains on the critical path ----
        z1 = z1_ref[t] + jnp.dot(h1.astype(jnp.bfloat16), w_hh1,
                                 preferred_element_type=jnp.float32)
        h1, c1 = lstm_gates(z1, c1)

        # ---- layer 2: add the h1_t-dependent partial (no per-step concatenate) ----
        z2 = z2_rec + jnp.dot(h1.astype(jnp.bfloat16), w_ih2,
                              preferred_element_type=jnp.float32) + b2
        h2, c2 = lstm_gates(z2, c2)

    # Linear head on the last timestep's top-layer hidden state (bf16 MXU, f32 accumulate,
    # lane-dense padded output -> unmasked vst).
    out_ref[...] = (jnp.dot(h2.astype(jnp.bfloat16), w_out_ref[...],
                            preferred_element_type=jnp.float32)
                    + b_out_ref[...])


def lstm_predictor(x, kparams):
    """x: (B, T, INPUT_SIZE) float32 -> (B, INPUT_SIZE) float32."""
    B, T, _ = x.shape
    (w_ih1, b1, w_hh1_bf, w_ih2_bf, w_hh2_bf, b2, w_out_pad, b_out_pad) = kparams

    # Hoisted layer-1 input projection: one (B*T, IN) @ (IN, 4H) matmul, bias folded in.
    z1_pre = x.reshape(B * T, INPUT_SIZE) @ w_ih1 + b1               # (B*T, 4H)
    z1_pre = z1_pre.reshape(B, T, 4 * HIDDEN).transpose(1, 0, 2)     # (T, B, 4H)

    vmem = pl.BlockSpec(memory_space=pltpu.MemorySpace.VMEM)
    out = pl.pallas_call(
        _lstm_predictor_kernel,
        out_shape=jax.ShapeDtypeStruct((B, OUT_PAD), jnp.float32),
        in_specs=[vmem] * 7,
        out_specs=vmem,
    )(z1_pre, w_hh1_bf, w_ih2_bf, w_hh2_bf, b2, w_out_pad, b_out_pad)
    return out[:, :INPUT_SIZE]


def make_params(key):
    """Deterministic synthetic params, PyTorch LSTM/Linear shapes, pre-permuted/transposed for kernel."""
    ks = jax.random.split(key, 10)
    H, IN = HIDDEN, INPUT_SIZE
    s = 0.1

    # PyTorch-native shapes (gate order along 4H: [i, f, g, o]).
    w_ih_l0 = s * jax.random.normal(ks[0], (4 * H, IN), jnp.float32)
    w_hh_l0 = s * jax.random.normal(ks[1], (4 * H, H), jnp.float32)
    b_ih_l0 = s * jax.random.normal(ks[2], (4 * H,), jnp.float32)
    b_hh_l0 = s * jax.random.normal(ks[3], (4 * H,), jnp.float32)

    w_ih_l1 = s * jax.random.normal(ks[4], (4 * H, H), jnp.float32)
    w_hh_l1 = s * jax.random.normal(ks[5], (4 * H, H), jnp.float32)
    b_ih_l1 = s * jax.random.normal(ks[6], (4 * H,), jnp.float32)
    b_hh_l1 = s * jax.random.normal(ks[7], (4 * H,), jnp.float32)

    w_lin = s * jax.random.normal(ks[8], (IN, H), jnp.float32)
    b_lin = s * jax.random.normal(ks[9], (IN,), jnp.float32)

    raw = (w_ih_l0, w_hh_l0, b_ih_l0, b_hh_l0,
           w_ih_l1, w_hh_l1, b_ih_l1, b_hh_l1,
           w_lin, b_lin)

    # Gate permutation: PyTorch [i, f, g, o] -> kernel [f, i, o, g] so the gate/cell-state
    # elementwise pairs land at matching lane offsets (fewer XLU realignments per step).
    perm = jnp.concatenate([
        jnp.arange(H, 2 * H),      # f
        jnp.arange(0, H),          # i
        jnp.arange(3 * H, 4 * H),  # o
        jnp.arange(2 * H, 3 * H),  # g
    ])

    # Kernel-layout params:
    #  - layer-1 input weight + fused bias stay f32 (used once in the wrapper projection)
    #  - recurrent / layer-2 weights pre-cast to bf16 for the MXU (f32 accumulation in-kernel)
    #  - head weight zero-padded to a lane-dense 128-wide slab, pre-cast to bf16
    w_out_pad = (jnp.zeros((H, OUT_PAD), jnp.float32).at[:, :IN].set(w_lin.T)
                 ).astype(jnp.bfloat16)
    b_out_pad = jnp.zeros((1, OUT_PAD), jnp.float32).at[0, :IN].set(b_lin)

    kparams = (
        w_ih_l0[perm].T,                                        # (IN, 4H) f32  (permuted gates)
        (b_ih_l0 + b_hh_l0)[perm].reshape(1, 4 * H),            # (1, 4H)  f32  (folded into z1_pre)
        w_hh_l0[perm].T.astype(jnp.bfloat16),                   # (H, 4H)  bf16
        w_ih_l1[perm].T.astype(jnp.bfloat16),                   # (H, 4H)  bf16
        w_hh_l1[perm].T.astype(jnp.bfloat16),                   # (H, 4H)  bf16
        (b_ih_l1 + b_hh_l1)[perm].reshape(1, 4 * H),            # (1, 4H)  f32
        w_out_pad,                                              # (H, 128) bf16
        b_out_pad,                                              # (1, 128) f32
    )
    return raw, kparams


def ref_forward(x, raw):
    """Pure-JAX f32 reference matching torch.nn.LSTM(batch_first=True, eval) + Linear."""
    (w_ih_l0, w_hh_l0, b_ih_l0, b_hh_l0,
     w_ih_l1, w_hh_l1, b_ih_l1, b_hh_l1,
     w_lin, b_lin) = raw
    H = HIDDEN

    def run_layer(xs, w_ih, w_hh, b_ih, b_hh):
        B, T, _ = xs.shape
        h = jnp.zeros((B, H), jnp.float32)
        c = jnp.zeros((B, H), jnp.float32)
        outs = []
        for t in range(T):
            z = xs[:, t] @ w_ih.T + h @ w_hh.T + b_ih + b_hh
            i = jax.nn.sigmoid(z[:, 0:H])
            f = jax.nn.sigmoid(z[:, H:2 * H])
            g = jnp.tanh(z[:, 2 * H:3 * H])
            o = jax.nn.sigmoid(z[:, 3 * H:4 * H])
            c = f * c + i * g
            h = o * jnp.tanh(c)
            outs.append(h)
        return jnp.stack(outs, axis=1)

    h1 = run_layer(x, w_ih_l0, w_hh_l0, b_ih_l0, b_hh_l0)
    h2 = run_layer(h1, w_ih_l1, w_hh_l1, b_ih_l1, b_hh_l1)
    return h2[:, -1] @ w_lin.T + b_lin


if __name__ == "__main__":
    key = jax.random.PRNGKey(0)
    k_x, k_p = jax.random.split(key)

    B, T = 2, 8
    x = jax.random.normal(k_x, (B, T, INPUT_SIZE), jnp.float32)

    raw, kparams = make_params(k_p)

    out = lstm_predictor(x, kparams)
    out = jax.block_until_ready(out)

    ref = ref_forward(x, raw)
    assert out.shape == (B, INPUT_SIZE)
    # Tolerance relaxed from 1e-5 because recurrent/head matmul operands are bf16
    # (f32 accumulation); observed error is O(1e-3) at these weight scales.
    assert jnp.allclose(out, ref, atol=5e-3, rtol=5e-3), (out, ref)

    print("KERNEL_OK")
</pallas_src>

<mosaic_0001>
module attributes {stable_mosaic.version = 11 : i64} {
  func.func @_lstm_predictor_kernel(%arg0: memref<8x2x256xf32, #tpu.memory_space<vmem>>, %arg1: memref<64x256xbf16, #tpu.memory_space<vmem>>, %arg2: memref<64x256xbf16, #tpu.memory_space<vmem>>, %arg3: memref<64x256xbf16, #tpu.memory_space<vmem>>, %arg4: memref<1x256xf32, #tpu.memory_space<vmem>>, %arg5: memref<64x128xbf16, #tpu.memory_space<vmem>>, %arg6: memref<1x128xf32, #tpu.memory_space<vmem>>, %arg7: memref<2x128xf32, #tpu.memory_space<vmem>>) attributes {dimension_semantics = [], scalar_prefetch = 0 : i64, scratch_operands = 0 : i64, tpu.core_type = #tpu.core_type<tc>} {
    %c0 = arith.constant 0 : index
    %c0_0 = arith.constant 0 : index
    %0 = vector.load %arg1[%c0, %c0_0] : memref<64x256xbf16, #tpu.memory_space<vmem>>, vector<64x256xbf16>
    %c0_1 = arith.constant 0 : index
    %c0_2 = arith.constant 0 : index
    %1 = vector.load %arg2[%c0_1, %c0_2] : memref<64x256xbf16, #tpu.memory_space<vmem>>, vector<64x256xbf16>
    %c0_3 = arith.constant 0 : index
    %c0_4 = arith.constant 0 : index
    %2 = vector.load %arg3[%c0_3, %c0_4] : memref<64x256xbf16, #tpu.memory_space<vmem>>, vector<64x256xbf16>
    %c0_5 = arith.constant 0 : index
    %c0_6 = arith.constant 0 : index
    %3 = vector.load %arg4[%c0_5, %c0_6] : memref<1x256xf32, #tpu.memory_space<vmem>>, vector<1x256xf32>
    %4 = vector.shape_cast %3 : vector<1x256xf32> to vector<1x256xf32>
    %5 = vector.broadcast %4 : vector<1x256xf32> to vector<2x256xf32>
    %6 = tpu.iota {dimensions = array<i32: 1>} : vector<2x256xi32>
    %c192_i32 = arith.constant 192 : i32
    %7 = vector.broadcast %c192_i32 : i32 to vector<2x256xi32>
    %8 = arith.cmpi sge, %6, %7 : vector<2x256xi32>
    %cst = arith.constant 0.000000e+00 : f32
    %9 = vector.broadcast %cst : f32 to vector<2x64xf32>
    %cst_7 = arith.constant 0.000000e+00 : f32
    %10 = vector.broadcast %cst_7 : f32 to vector<2x64xf32>
    %cst_8 = arith.constant 0.000000e+00 : f32
    %11 = vector.broadcast %cst_8 : f32 to vector<2x64xf32>
    %cst_9 = arith.constant 0.000000e+00 : f32
    %12 = vector.broadcast %cst_9 : f32 to vector<2x64xf32>
    %13 = arith.truncf %11 : vector<2x64xf32> to vector<2x64xbf16>
    %cst_10 = arith.constant dense<0.000000e+00> : vector<2x256xf32>
    %14 = tpu.matmul %13, %2, %cst_10 {dimension_numbers = #tpu.dot_dimension_numbers<[1], [0], [0], [1], [0, 0, 1, 1], [], []>} : vector<2x64xbf16>, vector<64x256xbf16>, vector<2x256xf32> -> vector<2x256xf32>
    %c0_11 = arith.constant 0 : index
    %c0_12 = arith.constant 0 : index
    %c0_13 = arith.constant 0 : index
    %15 = vector.load %arg0[%c0_11, %c0_12, %c0_13] : memref<8x2x256xf32, #tpu.memory_space<vmem>>, vector<1x2x256xf32>
    %16 = vector.shape_cast %15 : vector<1x2x256xf32> to vector<2x256xf32>
    %17 = arith.truncf %9 : vector<2x64xf32> to vector<2x64xbf16>
    %cst_14 = arith.constant dense<0.000000e+00> : vector<2x256xf32>
    %18 = tpu.matmul %17, %0, %cst_14 {dimension_numbers = #tpu.dot_dimension_numbers<[1], [0], [0], [1], [0, 0, 1, 1], [], []>} : vector<2x64xbf16>, vector<64x256xbf16>, vector<2x256xf32> -> vector<2x256xf32>
    %19 = arith.addf %16, %18 : vector<2x256xf32>
    %cst_15 = arith.constant 5.000000e-01 : f32
    %20 = vector.broadcast %cst_15 : f32 to vector<2x256xf32>
    %21 = arith.mulf %20, %19 : vector<2x256xf32>
    %22 = arith.select %8, %19, %21 : vector<2x256xi1>, vector<2x256xf32>
    %23 = math.tanh %22 : vector<2x256xf32>
    %cst_16 = arith.constant 5.000000e-01 : f32
    %24 = vector.broadcast %cst_16 : f32 to vector<2x256xf32>
    %25 = arith.mulf %24, %23 : vector<2x256xf32>
    %cst_17 = arith.constant 5.000000e-01 : f32
    %26 = vector.broadcast %cst_17 : f32 to vector<2x256xf32>
    %27 = arith.addf %25, %26 : vector<2x256xf32>
    %28 = arith.select %8, %23, %27 : vector<2x256xi1>, vector<2x256xf32>
    %29 = vector.extract_strided_slice %28 {offsets = [0, 0], sizes = [2, 64], strides = [1, 1]} : vector<2x256xf32> to vector<2x64xf32>
    %30 = vector.extract_strided_slice %28 {offsets = [0, 64], sizes = [2, 64], strides = [1, 1]} : vector<2x256xf32> to vector<2x64xf32>
    %31 = vector.extract_strided_slice %28 {offsets = [0, 128], sizes = [2, 64], strides = [1, 1]} : vector<2x256xf32> to vector<2x64xf32>
    %32 = vector.extract_strided_slice %28 {offsets = [0, 192], sizes = [2, 64], strides = [1, 1]} : vector<2x256xf32> to vector<2x64xf32>
    %33 = arith.mulf %29, %10 : vector<2x64xf32>
    %34 = arith.mulf %30, %32 : vector<2x64xf32>
    %35 = arith.addf %33, %34 : vector<2x64xf32>
    %36 = math.tanh %35 : vector<2x64xf32>
    %37 = arith.mulf %31, %36 : vector<2x64xf32>
    %38 = arith.truncf %37 : vector<2x64xf32> to vector<2x64xbf16>
    %cst_18 = arith.constant dense<0.000000e+00> : vector<2x256xf32>
    %39 = tpu.matmul %38, %1, %cst_18 {dimension_numbers = #tpu.dot_dimension_numbers<[1], [0], [0], [1], [0, 0, 1, 1], [], []>} : vector<2x64xbf16>, vector<64x256xbf16>, vector<2x256xf32> -> vector<2x256xf32>
    %40 = arith.addf %14, %39 : vector<2x256xf32>
    %41 = arith.addf %40, %5 : vector<2x256xf32>
    %cst_19 = arith.constant 5.000000e-01 : f32
    %42 = vector.broadcast %cst_19 : f32 to vector<2x256xf32>
    %43 = arith.mulf %42, %41 : vector<2x256xf32>
    %44 = arith.select %8, %41, %43 : vector<2x256xi1>, vector<2x256xf32>
    %45 = math.tanh %44 : vector<2x256xf32>
    %cst_20 = arith.constant 5.000000e-01 : f32
    %46 = vector.broadcast %cst_20 : f32 to vector<2x256xf32>
    %47 = arith.mulf %46, %45 : vector<2x256xf32>
    %cst_21 = arith.constant 5.000000e-01 : f32
    %48 = vector.broadcast %cst_21 : f32 to vector<2x256xf32>
    %49 = arith.addf %47, %48 : vector<2x256xf32>
    %50 = arith.select %8, %45, %49 : vector<2x256xi1>, vector<2x256xf32>
    %51 = vector.extract_strided_slice %50 {offsets = [0, 0], sizes = [2, 64], strides = [1, 1]} : vector<2x256xf32> to vector<2x64xf32>
    %52 = vector.extract_strided_slice %50 {offsets = [0, 64], sizes = [2, 64], strides = [1, 1]} : vector<2x256xf32> to vector<2x64xf32>
    %53 = vector.extract_strided_slice %50 {offsets = [0, 128], sizes = [2, 64], strides = [1, 1]} : vector<2x256xf32> to vector<2x64xf32>
    %54 = vector.extract_strided_slice %50 {offsets = [0, 192], sizes = [2, 64], strides = [1, 1]} : vector<2x256xf32> to vector<2x64xf32>
    %55 = arith.mulf %51, %12 : vector<2x64xf32>
    %56 = arith.mulf %52, %54 : vector<2x64xf32>
    %57 = arith.addf %55, %56 : vector<2x64xf32>
    %58 = math.tanh %57 : vector<2x64xf32>
    %59 = arith.mulf %53, %58 : vector<2x64xf32>
    %60 = arith.truncf %59 : vector<2x64xf32> to vector<2x64xbf16>
    %cst_22 = arith.constant dense<0.000000e+00> : vector<2x256xf32>
    %61 = tpu.matmul %60, %2, %cst_22 {dimension_numbers = #tpu.dot_dimension_numbers<[1], [0], [0], [1], [0, 0, 1, 1], [], []>} : vector<2x64xbf16>, vector<64x256xbf16>, vector<2x256xf32> -> vector<2x256xf32>
    %c1 = arith.constant 1 : index
    %c0_23 = arith.constant 0 : index
    %c0_24 = arith.constant 0 : index
    %62 = vector.load %arg0[%c1, %c0_23, %c0_24] : memref<8x2x256xf32, #tpu.memory_space<vmem>>, vector<1x2x256xf32>
    %63 = vector.shape_cast %62 : vector<1x2x256xf32> to vector<2x256xf32>
    %64 = arith.truncf %37 : vector<2x64xf32> to vector<2x64xbf16>
    %cst_25 = arith.constant dense<0.000000e+00> : vector<2x256xf32>
    %65 = tpu.matmul %64, %0, %cst_25 {dimension_numbers = #tpu.dot_dimension_numbers<[1], [0], [0], [1], [0, 0, 1, 1], [], []>} : vector<2x64xbf16>, vector<64x256xbf16>, vector<2x256xf32> -> vector<2x256xf32>
    %66 = arith.addf %63, %65 : vector<2x256xf32>
    %cst_26 = arith.constant 5.000000e-01 : f32
    %67 = vector.broadcast %cst_26 : f32 to vector<2x256xf32>
    %68 = arith.mulf %67, %66 : vector<2x256xf32>
    %69 = arith.select %8, %66, %68 : vector<2x256xi1>, vector<2x256xf32>
    %70 = math.tanh %69 : vector<2x256xf32>
    %cst_27 = arith.constant 5.000000e-01 : f32
    %71 = vector.broadcast %cst_27 : f32 to vector<2x256xf32>
    %72 = arith.mulf %71, %70 : vector<2x256xf32>
    %cst_28 = arith.constant 5.000000e-01 : f32
    %73 = vector.broadcast %cst_28 : f32 to vector<2x256xf32>
    %74 = arith.addf %72, %73 : vector<2x256xf32>
    %75 = arith.select %8, %70, %74 : vector<2x256xi1>, vector<2x256xf32>
    %76 = vector.extract_strided_slice %75 {offsets = [0, 0], sizes = [2, 64], strides = [1, 1]} : vector<2x256xf32> to vector<2x64xf32>
    %77 = vector.extract_strided_slice %75 {offsets = [0, 64], sizes = [2, 64], strides = [1, 1]} : vector<2x256xf32> to vector<2x64xf32>
    %78 = vector.extract_strided_slice %75 {offsets = [0, 128], sizes = [2, 64], strides = [1, 1]} : vector<2x256xf32> to vector<2x64xf32>
    %79 = vector.extract_strided_slice %75 {offsets = [0, 192], sizes = [2, 64], strides = [1, 1]} : vector<2x256xf32> to vector<2x64xf32>
    %80 = arith.mulf %76, %35 : vector<2x64xf32>
    %81 = arith.mulf %77, %79 : vector<2x64xf32>
    %82 = arith.addf %80, %81 : vector<2x64xf32>
    %83 = math.tanh %82 : vector<2x64xf32>
    %84 = arith.mulf %78, %83 : vector<2x64xf32>
    %85 = arith.truncf %84 : vector<2x64xf32> to vector<2x64xbf16>
    %cst_29 = arith.constant dense<0.000000e+00> : vector<2x256xf32>
    %86 = tpu.matmul %85, %1, %cst_29 {dimension_numbers = #tpu.dot_dimension_numbers<[1], [0], [0], [1], [0, 0, 1, 1], [], []>} : vector<2x64xbf16>, vector<64x256xbf16>, vector<2x256xf32> -> vector<2x256xf32>
    %87 = arith.addf %61, %86 : vector<2x256xf32>
    %88 = arith.addf %87, %5 : vector<2x256xf32>
    %cst_30 = arith.constant 5.000000e-01 : f32
    %89 = vector.broadcast %cst_30 : f32 to vector<2x256xf32>
    %90 = arith.mulf %89, %88 : vector<2x256xf32>
    %91 = arith.select %8, %88, %90 : vector<2x256xi1>, vector<2x256xf32>
    %92 = math.tanh %91 : vector<2x256xf32>
    %cst_31 = arith.constant 5.000000e-01 : f32
    %93 = vector.broadcast %cst_31 : f32 to vector<2x256xf32>
    %94 = arith.mulf %93, %92 : vector<2x256xf32>
    %cst_32 = arith.constant 5.000000e-01 : f32
    %95 = vector.broadcast %cst_32 : f32 to vector<2x256xf32>
    %96 = arith.addf %94, %95 : vector<2x256xf32>
    %97 = arith.select %8, %92, %96 : vector<2x256xi1>, vector<2x256xf32>
    %98 = vector.extract_strided_slice %97 {offsets = [0, 0], sizes = [2, 64], strides = [1, 1]} : vector<2x256xf32> to vector<2x64xf32>
    %99 = vector.extract_strided_slice %97 {offsets = [0, 64], sizes = [2, 64], strides = [1, 1]} : vector<2x256xf32> to vector<2x64xf32>
    %100 = vector.extract_strided_slice %97 {offsets = [0, 128], sizes = [2, 64], strides = [1, 1]} : vector<2x256xf32> to vector<2x64xf32>
    %101 = vector.extract_strided_slice %97 {offsets = [0, 192], sizes = [2, 64], strides = [1, 1]} : vector<2x256xf32> to vector<2x64xf32>
    %102 = arith.mulf %98, %57 : vector<2x64xf32>
    %103 = arith.mulf %99, %101 : vector<2x64xf32>
    %104 = arith.addf %102, %103 : vector<2x64xf32>
    %105 = math.tanh %104 : vector<2x64xf32>
    %106 = arith.mulf %100, %105 : vector<2x64xf32>
    %107 = arith.truncf %106 : vector<2x64xf32> to vector<2x64xbf16>
    %cst_33 = arith.constant dense<0.000000e+00> : vector<2x256xf32>
    %108 = tpu.matmul %107, %2, %cst_33 {dimension_numbers = #tpu.dot_dimension_numbers<[1], [0], [0], [1], [0, 0, 1, 1], [], []>} : vector<2x64xbf16>, vector<64x256xbf16>, vector<2x256xf32> -> vector<2x256xf32>
    %c2 = arith.constant 2 : index
    %c0_34 = arith.constant 0 : index
    %c0_35 = arith.constant 0 : index
    %109 = vector.load %arg0[%c2, %c0_34, %c0_35] : memref<8x2x256xf32, #tpu.memory_space<vmem>>, vector<1x2x256xf32>
    %110 = vector.shape_cast %109 : vector<1x2x256xf32> to vector<2x256xf32>
    %111 = arith.truncf %84 : vector<2x64xf32> to vector<2x64xbf16>
    %cst_36 = arith.constant dense<0.000000e+00> : vector<2x256xf32>
    %112 = tpu.matmul %111, %0, %cst_36 {dimension_numbers = #tpu.dot_dimension_numbers<[1], [0], [0], [1], [0, 0, 1, 1], [], []>} : vector<2x64xbf16>, vector<64x256xbf16>, vector<2x256xf32> -> vector<2x256xf32>
    %113 = arith.addf %110, %112 : vector<2x256xf32>
    %cst_37 = arith.constant 5.000000e-01 : f32
    %114 = vector.broadcast %cst_37 : f32 to vector<2x256xf32>
    %115 = arith.mulf %114, %113 : vector<2x256xf32>
    %116 = arith.select %8, %113, %115 : vector<2x256xi1>, vector<2x256xf32>
    %117 = math.tanh %116 : vector<2x256xf32>
    %cst_38 = arith.constant 5.000000e-01 : f32
    %118 = vector.broadcast %cst_38 : f32 to vector<2x256xf32>
    %119 = arith.mulf %118, %117 : vector<2x256xf32>
    %cst_39 = arith.constant 5.000000e-01 : f32
    %120 = vector.broadcast %cst_39 : f32 to vector<2x256xf32>
    %121 = arith.addf %119, %120 : vector<2x256xf32>
    %122 = arith.select %8, %117, %121 : vector<2x256xi1>, vector<2x256xf32>
    %123 = vector.extract_strided_slice %122 {offsets = [0, 0], sizes = [2, 64], strides = [1, 1]} : vector<2x256xf32> to vector<2x64xf32>
    %124 = vector.extract_strided_slice %122 {offsets = [0, 64], sizes = [2, 64], strides = [1, 1]} : vector<2x256xf32> to vector<2x64xf32>
    %125 = vector.extract_strided_slice %122 {offsets = [0, 128], sizes = [2, 64], strides = [1, 1]} : vector<2x256xf32> to vector<2x64xf32>
    %126 = vector.extract_strided_slice %122 {offsets = [0, 192], sizes = [2, 64], strides = [1, 1]} : vector<2x256xf32> to vector<2x64xf32>
    %127 = arith.mulf %123, %82 : vector<2x64xf32>
    %128 = arith.mulf %124, %126 : vector<2x64xf32>
    %129 = arith.addf %127, %128 : vector<2x64xf32>
    %130 = math.tanh %129 : vector<2x64xf32>
    %131 = arith.mulf %125, %130 : vector<2x64xf32>
    %132 = arith.truncf %131 : vector<2x64xf32> to vector<2x64xbf16>
    %cst_40 = arith.constant dense<0.000000e+00> : vector<2x256xf32>
    %133 = tpu.matmul %132, %1, %cst_40 {dimension_numbers = #tpu.dot_dimension_numbers<[1], [0], [0], [1], [0, 0, 1, 1], [], []>} : vector<2x64xbf16>, vector<64x256xbf16>, vector<2x256xf32> -> vector<2x256xf32>
    %134 = arith.addf %108, %133 : vector<2x256xf32>
    %135 = arith.addf %134, %5 : vector<2x256xf32>
    %cst_41 = arith.constant 5.000000e-01 : f32
    %136 = vector.broadcast %cst_41 : f32 to vector<2x256xf32>
    %137 = arith.mulf %136, %135 : vector<2x256xf32>
    %138 = arith.select %8, %135, %137 : vector<2x256xi1>, vector<2x256xf32>
    %139 = math.tanh %138 : vector<2x256xf32>
    %cst_42 = arith.constant 5.000000e-01 : f32
    %140 = vector.broadcast %cst_42 : f32 to vector<2x256xf32>
    %141 = arith.mulf %140, %139 : vector<2x256xf32>
    %cst_43 = arith.constant 5.000000e-01 : f32
    %142 = vector.broadcast %cst_43 : f32 to vector<2x256xf32>
    %143 = arith.addf %141, %142 : vector<2x256xf32>
    %144 = arith.select %8, %139, %143 : vector<2x256xi1>, vector<2x256xf32>
    %145 = vector.extract_strided_slice %144 {offsets = [0, 0], sizes = [2, 64], strides = [1, 1]} : vector<2x256xf32> to vector<2x64xf32>
    %146 = vector.extract_strided_slice %144 {offsets = [0, 64], sizes = [2, 64], strides = [1, 1]} : vector<2x256xf32> to vector<2x64xf32>
    %147 = vector.extract_strided_slice %144 {offsets = [0, 128], sizes = [2, 64], strides = [1, 1]} : vector<2x256xf32> to vector<2x64xf32>
    %148 = vector.extract_strided_slice %144 {offsets = [0, 192], sizes = [2, 64], strides = [1, 1]} : vector<2x256xf32> to vector<2x64xf32>
    %149 = arith.mulf %145, %104 : vector<2x64xf32>
    %150 = arith.mulf %146, %148 : vector<2x64xf32>
    %151 = arith.addf %149, %150 : vector<2x64xf32>
    %152 = math.tanh %151 : vector<2x64xf32>
    %153 = arith.mulf %147, %152 : vector<2x64xf32>
    %154 = arith.truncf %153 : vector<2x64xf32> to vector<2x64xbf16>
    %cst_44 = arith.constant dense<0.000000e+00> : vector<2x256xf32>
    %155 = tpu.matmul %154, %2, %cst_44 {dimension_numbers = #tpu.dot_dimension_numbers<[1], [0], [0], [1], [0, 0, 1, 1], [], []>} : vector<2x64xbf16>, vector<64x256xbf16>, vector<2x256xf32> -> vector<2x256xf32>
    %c3 = arith.constant 3 : index
    %c0_45 = arith.constant 0 : index
    %c0_46 = arith.constant 0 : index
    %156 = vector.load %arg0[%c3, %c0_45, %c0_46] : memref<8x2x256xf32, #tpu.memory_space<vmem>>, vector<1x2x256xf32>
    %157 = vector.shape_cast %156 : vector<1x2x256xf32> to vector<2x256xf32>
    %158 = arith.truncf %131 : vector<2x64xf32> to vector<2x64xbf16>
    %cst_47 = arith.constant dense<0.000000e+00> : vector<2x256xf32>
    %159 = tpu.matmul %158, %0, %cst_47 {dimension_numbers = #tpu.dot_dimension_numbers<[1], [0], [0], [1], [0, 0, 1, 1], [], []>} : vector<2x64xbf16>, vector<64x256xbf16>, vector<2x256xf32> -> vector<2x256xf32>
    %160 = arith.addf %157, %159 : vector<2x256xf32>
    %cst_48 = arith.constant 5.000000e-01 : f32
    %161 = vector.broadcast %cst_48 : f32 to vector<2x256xf32>
    %162 = arith.mulf %161, %160 : vector<2x256xf32>
    %163 = arith.select %8, %160, %162 : vector<2x256xi1>, vector<2x256xf32>
    %164 = math.tanh %163 : vector<2x256xf32>
    %cst_49 = arith.constant 5.000000e-01 : f32
    %165 = vector.broadcast %cst_49 : f32 to vector<2x256xf32>
    %166 = arith.mulf %165, %164 : vector<2x256xf32>
    %cst_50 = arith.constant 5.000000e-01 : f32
    %167 = vector.broadcast %cst_50 : f32 to vector<2x256xf32>
    %168 = arith.addf %166, %167 : vector<2x256xf32>
    %169 = arith.select %8, %164, %168 : vector<2x256xi1>, vector<2x256xf32>
    %170 = vector.extract_strided_slice %169 {offsets = [0, 0], sizes = [2, 64], strides = [1, 1]} : vector<2x256xf32> to vector<2x64xf32>
    %171 = vector.extract_strided_slice %169 {offsets = [0, 64], sizes = [2, 64], strides = [1, 1]} : vector<2x256xf32> to vector<2x64xf32>
    %172 = vector.extract_strided_slice %169 {offsets = [0, 128], sizes = [2, 64], strides = [1, 1]} : vector<2x256xf32> to vector<2x64xf32>
    %173 = vector.extract_strided_slice %169 {offsets = [0, 192], sizes = [2, 64], strides = [1, 1]} : vector<2x256xf32> to vector<2x64xf32>
    %174 = arith.mulf %170, %129 : vector<2x64xf32>
    %175 = arith.mulf %171, %173 : vector<2x64xf32>
    %176 = arith.addf %174, %175 : vector<2x64xf32>
    %177 = math.tanh %176 : vector<2x64xf32>
    %178 = arith.mulf %172, %177 : vector<2x64xf32>
    %179 = arith.truncf %178 : vector<2x64xf32> to vector<2x64xbf16>
    %cst_51 = arith.constant dense<0.000000e+00> : vector<2x256xf32>
    %180 = tpu.matmul %179, %1, %cst_51 {dimension_numbers = #tpu.dot_dimension_numbers<[1], [0], [0], [1], [0, 0, 1, 1], [], []>} : vector<2x64xbf16>, vector<64x256xbf16>, vector<2x256xf32> -> vector<2x256xf32>
    %181 = arith.addf %155, %180 : vector<2x256xf32>
    %182 = arith.addf %181, %5 : vector<2x256xf32>
    %cst_52 = arith.constant 5.000000e-01 : f32
    %183 = vector.broadcast %cst_52 : f32 to vector<2x256xf32>
    %184 = arith.mulf %183, %182 : vector<2x256xf32>
    %185 = arith.select %8, %182, %184 : vector<2x256xi1>, vector<2x256xf32>
    %186 = math.tanh %185 : vector<2x256xf32>
    %cst_53 = arith.constant 5.000000e-01 : f32
    %187 = vector.broadcast %cst_53 : f32 to vector<2x256xf32>
    %188 = arith.mulf %187, %186 : vector<2x256xf32>
    %cst_54 = arith.constant 5.000000e-01 : f32
    %189 = vector.broadcast %cst_54 : f32 to vector<2x256xf32>
    %190 = arith.addf %188, %189 : vector<2x256xf32>
    %191 = arith.select %8, %186, %190 : vector<2x256xi1>, vector<2x256xf32>
    %192 = vector.extract_strided_slice %191 {offsets = [0, 0], sizes = [2, 64], strides = [1, 1]} : vector<2x256xf32> to vector<2x64xf32>
    %193 = vector.extract_strided_slice %191 {offsets = [0, 64], sizes = [2, 64], strides = [1, 1]} : vector<2x256xf32> to vector<2x64xf32>
    %194 = vector.extract_strided_slice %191 {offsets = [0, 128], sizes = [2, 64], strides = [1, 1]} : vector<2x256xf32> to vector<2x64xf32>
    %195 = vector.extract_strided_slice %191 {offsets = [0, 192], sizes = [2, 64], strides = [1, 1]} : vector<2x256xf32> to vector<2x64xf32>
    %196 = arith.mulf %192, %151 : vector<2x64xf32>
    %197 = arith.mulf %193, %195 : vector<2x64xf32>
    %198 = arith.addf %196, %197 : vector<2x64xf32>
    %199 = math.tanh %198 : vector<2x64xf32>
    %200 = arith.mulf %194, %199 : vector<2x64xf32>
    %201 = arith.truncf %200 : vector<2x64xf32> to vector<2x64xbf16>
    %cst_55 = arith.constant dense<0.000000e+00> : vector<2x256xf32>
    %202 = tpu.matmul %201, %2, %cst_55 {dimension_numbers = #tpu.dot_dimension_numbers<[1], [0], [0], [1], [0, 0, 1, 1], [], []>} : vector<2x64xbf16>, vector<64x256xbf16>, vector<2x256xf32> -> vector<2x256xf32>
    %c4 = arith.constant 4 : index
    %c0_56 = arith.constant 0 : index
    %c0_57 = arith.constant 0 : index
    %203 = vector.load %arg0[%c4, %c0_56, %c0_57] : memref<8x2x256xf32, #tpu.memory_space<vmem>>, vector<1x2x256xf32>
    %204 = vector.shape_cast %203 : vector<1x2x256xf32> to vector<2x256xf32>
    %205 = arith.truncf %178 : vector<2x64xf32> to vector<2x64xbf16>
    %cst_58 = arith.constant dense<0.000000e+00> : vector<2x256xf32>
    %206 = tpu.matmul %205, %0, %cst_58 {dimension_numbers = #tpu.dot_dimension_numbers<[1], [0], [0], [1], [0, 0, 1, 1], [], []>} : vector<2x64xbf16>, vector<64x256xbf16>, vector<2x256xf32> -> vector<2x256xf32>
    %207 = arith.addf %204, %206 : vector<2x256xf32>
    %cst_59 = arith.constant 5.000000e-01 : f32
    %208 = vector.broadcast %cst_59 : f32 to vector<2x256xf32>
    %209 = arith.mulf %208, %207 : vector<2x256xf32>
    %210 = arith.select %8, %207, %209 : vector<2x256xi1>, vector<2x256xf32>
    %211 = math.tanh %210 : vector<2x256xf32>
    %cst_60 = arith.constant 5.000000e-01 : f32
    %212 = vector.broadcast %cst_60 : f32 to vector<2x256xf32>
    %213 = arith.mulf %212, %211 : vector<2x256xf32>
    %cst_61 = arith.constant 5.000000e-01 : f32
    %214 = vector.broadcast %cst_61 : f32 to vector<2x256xf32>
    %215 = arith.addf %213, %214 : vector<2x256xf32>
    %216 = arith.select %8, %211, %215 : vector<2x256xi1>, vector<2x256xf32>
    %217 = vector.extract_strided_slice %216 {offsets = [0, 0], sizes = [2, 64], strides = [1, 1]} : vector<2x256xf32> to vector<2x64xf32>
    %218 = vector.extract_strided_slice %216 {offsets = [0, 64], sizes = [2, 64], strides = [1, 1]} : vector<2x256xf32> to vector<2x64xf32>
    %219 = vector.extract_strided_slice %216 {offsets = [0, 128], sizes = [2, 64], strides = [1, 1]} : vector<2x256xf32> to vector<2x64xf32>
    %220 = vector.extract_strided_slice %216 {offsets = [0, 192], sizes = [2, 64], strides = [1, 1]} : vector<2x256xf32> to vector<2x64xf32>
    %221 = arith.mulf %217, %176 : vector<2x64xf32>
    %222 = arith.mulf %218, %220 : vector<2x64xf32>
    %223 = arith.addf %221, %222 : vector<2x64xf32>
    %224 = math.tanh %223 : vector<2x64xf32>
    %225 = arith.mulf %219, %224 : vector<2x64xf32>
    %226 = arith.truncf %225 : vector<2x64xf32> to vector<2x64xbf16>
    %cst_62 = arith.constant dense<0.000000e+00> : vector<2x256xf32>
    %227 = tpu.matmul %226, %1, %cst_62 {dimension_numbers = #tpu.dot_dimension_numbers<[1], [0], [0], [1], [0, 0, 1, 1], [], []>} : vector<2x64xbf16>, vector<64x256xbf16>, vector<2x256xf32> -> vector<2x256xf32>
    %228 = arith.addf %202, %227 : vector<2x256xf32>
    %229 = arith.addf %228, %5 : vector<2x256xf32>
    %cst_63 = arith.constant 5.000000e-01 : f32
    %230 = vector.broadcast %cst_63 : f32 to vector<2x256xf32>
    %231 = arith.mulf %230, %229 : vector<2x256xf32>
    %232 = arith.select %8, %229, %231 : vector<2x256xi1>, vector<2x256xf32>
    %233 = math.tanh %232 : vector<2x256xf32>
    %cst_64 = arith.constant 5.000000e-01 : f32
    %234 = vector.broadcast %cst_64 : f32 to vector<2x256xf32>
    %235 = arith.mulf %234, %233 : vector<2x256xf32>
    %cst_65 = arith.constant 5.000000e-01 : f32
    %236 = vector.broadcast %cst_65 : f32 to vector<2x256xf32>
    %237 = arith.addf %235, %236 : vector<2x256xf32>
    %238 = arith.select %8, %233, %237 : vector<2x256xi1>, vector<2x256xf32>
    %239 = vector.extract_strided_slice %238 {offsets = [0, 0], sizes = [2, 64], strides = [1, 1]} : vector<2x256xf32> to vector<2x64xf32>
    %240 = vector.extract_strided_slice %238 {offsets = [0, 64], sizes = [2, 64], strides = [1, 1]} : vector<2x256xf32> to vector<2x64xf32>
    %241 = vector.extract_strided_slice %238 {offsets = [0, 128], sizes = [2, 64], strides = [1, 1]} : vector<2x256xf32> to vector<2x64xf32>
    %242 = vector.extract_strided_slice %238 {offsets = [0, 192], sizes = [2, 64], strides = [1, 1]} : vector<2x256xf32> to vector<2x64xf32>
    %243 = arith.mulf %239, %198 : vector<2x64xf32>
    %244 = arith.mulf %240, %242 : vector<2x64xf32>
    %245 = arith.addf %243, %244 : vector<2x64xf32>
    %246 = math.tanh %245 : vector<2x64xf32>
    %247 = arith.mulf %241, %246 : vector<2x64xf32>
    %248 = arith.truncf %247 : vector<2x64xf32> to vector<2x64xbf16>
    %cst_66 = arith.constant dense<0.000000e+00> : vector<2x256xf32>
    %249 = tpu.matmul %248, %2, %cst_66 {dimension_numbers = #tpu.dot_dimension_numbers<[1], [0], [0], [1], [0, 0, 1, 1], [], []>} : vector<2x64xbf16>, vector<64x256xbf16>, vector<2x256xf32> -> vector<2x256xf32>
    %c5 = arith.constant 5 : index
    %c0_67 = arith.constant 0 : index
    %c0_68 = arith.constant 0 : index
    %250 = vector.load %arg0[%c5, %c0_67, %c0_68] : memref<8x2x256xf32, #tpu.memory_space<vmem>>, vector<1x2x256xf32>
    %251 = vector.shape_cast %250 : vector<1x2x256xf32> to vector<2x256xf32>
    %252 = arith.truncf %225 : vector<2x64xf32> to vector<2x64xbf16>
    %cst_69 = arith.constant dense<0.000000e+00> : vector<2x256xf32>
    %253 = tpu.matmul %252, %0, %cst_69 {dimension_numbers = #tpu.dot_dimension_numbers<[1], [0], [0], [1], [0, 0, 1, 1], [], []>} : vector<2x64xbf16>, vector<64x256xbf16>, vector<2x256xf32> -> vector<2x256xf32>
    %254 = arith.addf %251, %253 : vector<2x256xf32>
    %cst_70 = arith.constant 5.000000e-01 : f32
    %255 = vector.broadcast %cst_70 : f32 to vector<2x256xf32>
    %256 = arith.mulf %255, %254 : vector<2x256xf32>
    %257 = arith.select %8, %254, %256 : vector<2x256xi1>, vector<2x256xf32>
    %258 = math.tanh %257 : vector<2x256xf32>
    %cst_71 = arith.constant 5.000000e-01 : f32
    %259 = vector.broadcast %cst_71 : f32 to vector<2x256xf32>
    %260 = arith.mulf %259, %258 : vector<2x256xf32>
    %cst_72 = arith.constant 5.000000e-01 : f32
    %261 = vector.broadcast %cst_72 : f32 to vector<2x256xf32>
    %262 = arith.addf %260, %261 : vector<2x256xf32>
    %263 = arith.select %8, %258, %262 : vector<2x256xi1>, vector<2x256xf32>
    %264 = vector.extract_strided_slice %263 {offsets = [0, 0], sizes = [2, 64], strides = [1, 1]} : vector<2x256xf32> to vector<2x64xf32>
    %265 = vector.extract_strided_slice %263 {offsets = [0, 64], sizes = [2, 64], strides = [1, 1]} : vector<2x256xf32> to vector<2x64xf32>
    %266 = vector.extract_strided_slice %263 {offsets = [0, 128], sizes = [2, 64], strides = [1, 1]} : vector<2x256xf32> to vector<2x64xf32>
    %267 = vector.extract_strided_slice %263 {offsets = [0, 192], sizes = [2, 64], strides = [1, 1]} : vector<2x256xf32> to vector<2x64xf32>
    %268 = arith.mulf %264, %223 : vector<2x64xf32>
    %269 = arith.mulf %265, %267 : vector<2x64xf32>
    %270 = arith.addf %268, %269 : vector<2x64xf32>
    %271 = math.tanh %270 : vector<2x64xf32>
    %272 = arith.mulf %266, %271 : vector<2x64xf32>
    %273 = arith.truncf %272 : vector<2x64xf32> to vector<2x64xbf16>
    %cst_73 = arith.constant dense<0.000000e+00> : vector<2x256xf32>
    %274 = tpu.matmul %273, %1, %cst_73 {dimension_numbers = #tpu.dot_dimension_numbers<[1], [0], [0], [1], [0, 0, 1, 1], [], []>} : vector<2x64xbf16>, vector<64x256xbf16>, vector<2x256xf32> -> vector<2x256xf32>
    %275 = arith.addf %249, %274 : vector<2x256xf32>
    %276 = arith.addf %275, %5 : vector<2x256xf32>
    %cst_74 = arith.constant 5.000000e-01 : f32
    %277 = vector.broadcast %cst_74 : f32 to vector<2x256xf32>
    %278 = arith.mulf %277, %276 : vector<2x256xf32>
    %279 = arith.select %8, %276, %278 : vector<2x256xi1>, vector<2x256xf32>
    %280 = math.tanh %279 : vector<2x256xf32>
    %cst_75 = arith.constant 5.000000e-01 : f32
    %281 = vector.broadcast %cst_75 : f32 to vector<2x256xf32>
    %282 = arith.mulf %281, %280 : vector<2x256xf32>
    %cst_76 = arith.constant 5.000000e-01 : f32
    %283 = vector.broadcast %cst_76 : f32 to vector<2x256xf32>
    %284 = arith.addf %282, %283 : vector<2x256xf32>
    %285 = arith.select %8, %280, %284 : vector<2x256xi1>, vector<2x256xf32>
    %286 = vector.extract_strided_slice %285 {offsets = [0, 0], sizes = [2, 64], strides = [1, 1]} : vector<2x256xf32> to vector<2x64xf32>
    %287 = vector.extract_strided_slice %285 {offsets = [0, 64], sizes = [2, 64], strides = [1, 1]} : vector<2x256xf32> to vector<2x64xf32>
    %288 = vector.extract_strided_slice %285 {offsets = [0, 128], sizes = [2, 64], strides = [1, 1]} : vector<2x256xf32> to vector<2x64xf32>
    %289 = vector.extract_strided_slice %285 {offsets = [0, 192], sizes = [2, 64], strides = [1, 1]} : vector<2x256xf32> to vector<2x64xf32>
    %290 = arith.mulf %286, %245 : vector<2x64xf32>
    %291 = arith.mulf %287, %289 : vector<2x64xf32>
    %292 = arith.addf %290, %291 : vector<2x64xf32>
    %293 = math.tanh %292 : vector<2x64xf32>
    %294 = arith.mulf %288, %293 : vector<2x64xf32>
    %295 = arith.truncf %294 : vector<2x64xf32> to vector<2x64xbf16>
    %cst_77 = arith.constant dense<0.000000e+00> : vector<2x256xf32>
    %296 = tpu.matmul %295, %2, %cst_77 {dimension_numbers = #tpu.dot_dimension_numbers<[1], [0], [0], [1], [0, 0, 1, 1], [], []>} : vector<2x64xbf16>, vector<64x256xbf16>, vector<2x256xf32> -> vector<2x256xf32>
    %c6 = arith.constant 6 : index
    %c0_78 = arith.constant 0 : index
    %c0_79 = arith.constant 0 : index
    %297 = vector.load %arg0[%c6, %c0_78, %c0_79] : memref<8x2x256xf32, #tpu.memory_space<vmem>>, vector<1x2x256xf32>
    %298 = vector.shape_cast %297 : vector<1x2x256xf32> to vector<2x256xf32>
    %299 = arith.truncf %272 : vector<2x64xf32> to vector<2x64xbf16>
    %cst_80 = arith.constant dense<0.000000e+00> : vector<2x256xf32>
    %300 = tpu.matmul %299, %0, %cst_80 {dimension_numbers = #tpu.dot_dimension_numbers<[1], [0], [0], [1], [0, 0, 1, 1], [], []>} : vector<2x64xbf16>, vector<64x256xbf16>, vector<2x256xf32> -> vector<2x256xf32>
    %301 = arith.addf %298, %300 : vector<2x256xf32>
    %cst_81 = arith.constant 5.000000e-01 : f32
    %302 = vector.broadcast %cst_81 : f32 to vector<2x256xf32>
    %303 = arith.mulf %302, %301 : vector<2x256xf32>
    %304 = arith.select %8, %301, %303 : vector<2x256xi1>, vector<2x256xf32>
    %305 = math.tanh %304 : vector<2x256xf32>
    %cst_82 = arith.constant 5.000000e-01 : f32
    %306 = vector.broadcast %cst_82 : f32 to vector<2x256xf32>
    %307 = arith.mulf %306, %305 : vector<2x256xf32>
    %cst_83 = arith.constant 5.000000e-01 : f32
    %308 = vector.broadcast %cst_83 : f32 to vector<2x256xf32>
    %309 = arith.addf %307, %308 : vector<2x256xf32>
    %310 = arith.select %8, %305, %309 : vector<2x256xi1>, vector<2x256xf32>
    %311 = vector.extract_strided_slice %310 {offsets = [0, 0], sizes = [2, 64], strides = [1, 1]} : vector<2x256xf32> to vector<2x64xf32>
    %312 = vector.extract_strided_slice %310 {offsets = [0, 64], sizes = [2, 64], strides = [1, 1]} : vector<2x256xf32> to vector<2x64xf32>
    %313 = vector.extract_strided_slice %310 {offsets = [0, 128], sizes = [2, 64], strides = [1, 1]} : vector<2x256xf32> to vector<2x64xf32>
    %314 = vector.extract_strided_slice %310 {offsets = [0, 192], sizes = [2, 64], strides = [1, 1]} : vector<2x256xf32> to vector<2x64xf32>
    %315 = arith.mulf %311, %270 : vector<2x64xf32>
    %316 = arith.mulf %312, %314 : vector<2x64xf32>
    %317 = arith.addf %315, %316 : vector<2x64xf32>
    %318 = math.tanh %317 : vector<2x64xf32>
    %319 = arith.mulf %313, %318 : vector<2x64xf32>
    %320 = arith.truncf %319 : vector<2x64xf32> to vector<2x64xbf16>
    %cst_84 = arith.constant dense<0.000000e+00> : vector<2x256xf32>
    %321 = tpu.matmul %320, %1, %cst_84 {dimension_numbers = #tpu.dot_dimension_numbers<[1], [0], [0], [1], [0, 0, 1, 1], [], []>} : vector<2x64xbf16>, vector<64x256xbf16>, vector<2x256xf32> -> vector<2x256xf32>
    %322 = arith.addf %296, %321 : vector<2x256xf32>
    %323 = arith.addf %322, %5 : vector<2x256xf32>
    %cst_85 = arith.constant 5.000000e-01 : f32
    %324 = vector.broadcast %cst_85 : f32 to vector<2x256xf32>
    %325 = arith.mulf %324, %323 : vector<2x256xf32>
    %326 = arith.select %8, %323, %325 : vector<2x256xi1>, vector<2x256xf32>
    %327 = math.tanh %326 : vector<2x256xf32>
    %cst_86 = arith.constant 5.000000e-01 : f32
    %328 = vector.broadcast %cst_86 : f32 to vector<2x256xf32>
    %329 = arith.mulf %328, %327 : vector<2x256xf32>
    %cst_87 = arith.constant 5.000000e-01 : f32
    %330 = vector.broadcast %cst_87 : f32 to vector<2x256xf32>
    %331 = arith.addf %329, %330 : vector<2x256xf32>
    %332 = arith.select %8, %327, %331 : vector<2x256xi1>, vector<2x256xf32>
    %333 = vector.extract_strided_slice %332 {offsets = [0, 0], sizes = [2, 64], strides = [1, 1]} : vector<2x256xf32> to vector<2x64xf32>
    %334 = vector.extract_strided_slice %332 {offsets = [0, 64], sizes = [2, 64], strides = [1, 1]} : vector<2x256xf32> to vector<2x64xf32>
    %335 = vector.extract_strided_slice %332 {offsets = [0, 128], sizes = [2, 64], strides = [1, 1]} : vector<2x256xf32> to vector<2x64xf32>
    %336 = vector.extract_strided_slice %332 {offsets = [0, 192], sizes = [2, 64], strides = [1, 1]} : vector<2x256xf32> to vector<2x64xf32>
    %337 = arith.mulf %333, %292 : vector<2x64xf32>
    %338 = arith.mulf %334, %336 : vector<2x64xf32>
    %339 = arith.addf %337, %338 : vector<2x64xf32>
    %340 = math.tanh %339 : vector<2x64xf32>
    %341 = arith.mulf %335, %340 : vector<2x64xf32>
    %342 = arith.truncf %341 : vector<2x64xf32> to vector<2x64xbf16>
    %cst_88 = arith.constant dense<0.000000e+00> : vector<2x256xf32>
    %343 = tpu.matmul %342, %2, %cst_88 {dimension_numbers = #tpu.dot_dimension_numbers<[1], [0], [0], [1], [0, 0, 1, 1], [], []>} : vector<2x64xbf16>, vector<64x256xbf16>, vector<2x256xf32> -> vector<2x256xf32>
    %c7 = arith.constant 7 : index
    %c0_89 = arith.constant 0 : index
    %c0_90 = arith.constant 0 : index
    %344 = vector.load %arg0[%c7, %c0_89, %c0_90] : memref<8x2x256xf32, #tpu.memory_space<vmem>>, vector<1x2x256xf32>
    %345 = vector.shape_cast %344 : vector<1x2x256xf32> to vector<2x256xf32>
    %346 = arith.truncf %319 : vector<2x64xf32> to vector<2x64xbf16>
    %cst_91 = arith.constant dense<0.000000e+00> : vector<2x256xf32>
    %347 = tpu.matmul %346, %0, %cst_91 {dimension_numbers = #tpu.dot_dimension_numbers<[1], [0], [0], [1], [0, 0, 1, 1], [], []>} : vector<2x64xbf16>, vector<64x256xbf16>, vector<2x256xf32> -> vector<2x256xf32>
    %348 = arith.addf %345, %347 : vector<2x256xf32>
    %cst_92 = arith.constant 5.000000e-01 : f32
    %349 = vector.broadcast %cst_92 : f32 to vector<2x256xf32>
    %350 = arith.mulf %349, %348 : vector<2x256xf32>
    %351 = arith.select %8, %348, %350 : vector<2x256xi1>, vector<2x256xf32>
    %352 = math.tanh %351 : vector<2x256xf32>
    %cst_93 = arith.constant 5.000000e-01 : f32
    %353 = vector.broadcast %cst_93 : f32 to vector<2x256xf32>
    %354 = arith.mulf %353, %352 : vector<2x256xf32>
    %cst_94 = arith.constant 5.000000e-01 : f32
    %355 = vector.broadcast %cst_94 : f32 to vector<2x256xf32>
    %356 = arith.addf %354, %355 : vector<2x256xf32>
    %357 = arith.select %8, %352, %356 : vector<2x256xi1>, vector<2x256xf32>
    %358 = vector.extract_strided_slice %357 {offsets = [0, 0], sizes = [2, 64], strides = [1, 1]} : vector<2x256xf32> to vector<2x64xf32>
    %359 = vector.extract_strided_slice %357 {offsets = [0, 64], sizes = [2, 64], strides = [1, 1]} : vector<2x256xf32> to vector<2x64xf32>
    %360 = vector.extract_strided_slice %357 {offsets = [0, 128], sizes = [2, 64], strides = [1, 1]} : vector<2x256xf32> to vector<2x64xf32>
    %361 = vector.extract_strided_slice %357 {offsets = [0, 192], sizes = [2, 64], strides = [1, 1]} : vector<2x256xf32> to vector<2x64xf32>
    %362 = arith.mulf %358, %317 : vector<2x64xf32>
    %363 = arith.mulf %359, %361 : vector<2x64xf32>
    %364 = arith.addf %362, %363 : vector<2x64xf32>
    %365 = math.tanh %364 : vector<2x64xf32>
    %366 = arith.mulf %360, %365 : vector<2x64xf32>
    %367 = arith.truncf %366 : vector<2x64xf32> to vector<2x64xbf16>
    %cst_95 = arith.constant dense<0.000000e+00> : vector<2x256xf32>
    %368 = tpu.matmul %367, %1, %cst_95 {dimension_numbers = #tpu.dot_dimension_numbers<[1], [0], [0], [1], [0, 0, 1, 1], [], []>} : vector<2x64xbf16>, vector<64x256xbf16>, vector<2x256xf32> -> vector<2x256xf32>
    %369 = arith.addf %343, %368 : vector<2x256xf32>
    %370 = arith.addf %369, %5 : vector<2x256xf32>
    %cst_96 = arith.constant 5.000000e-01 : f32
    %371 = vector.broadcast %cst_96 : f32 to vector<2x256xf32>
    %372 = arith.mulf %371, %370 : vector<2x256xf32>
    %373 = arith.select %8, %370, %372 : vector<2x256xi1>, vector<2x256xf32>
    %374 = math.tanh %373 : vector<2x256xf32>
    %cst_97 = arith.constant 5.000000e-01 : f32
    %375 = vector.broadcast %cst_97 : f32 to vector<2x256xf32>
    %376 = arith.mulf %375, %374 : vector<2x256xf32>
    %cst_98 = arith.constant 5.000000e-01 : f32
    %377 = vector.broadcast %cst_98 : f32 to vector<2x256xf32>
    %378 = arith.addf %376, %377 : vector<2x256xf32>
    %379 = arith.select %8, %374, %378 : vector<2x256xi1>, vector<2x256xf32>
    %380 = vector.extract_strided_slice %379 {offsets = [0, 0], sizes = [2, 64], strides = [1, 1]} : vector<2x256xf32> to vector<2x64xf32>
    %381 = vector.extract_strided_slice %379 {offsets = [0, 64], sizes = [2, 64], strides = [1, 1]} : vector<2x256xf32> to vector<2x64xf32>
    %382 = vector.extract_strided_slice %379 {offsets = [0, 128], sizes = [2, 64], strides = [1, 1]} : vector<2x256xf32> to vector<2x64xf32>
    %383 = vector.extract_strided_slice %379 {offsets = [0, 192], sizes = [2, 64], strides = [1, 1]} : vector<2x256xf32> to vector<2x64xf32>
    %384 = arith.mulf %380, %339 : vector<2x64xf32>
    %385 = arith.mulf %381, %383 : vector<2x64xf32>
    %386 = arith.addf %384, %385 : vector<2x64xf32>
    %387 = math.tanh %386 : vector<2x64xf32>
    %388 = arith.mulf %382, %387 : vector<2x64xf32>
    %389 = arith.truncf %388 : vector<2x64xf32> to vector<2x64xbf16>
    %c0_99 = arith.constant 0 : index
    %c0_100 = arith.constant 0 : index
    %390 = vector.load %arg5[%c0_99, %c0_100] : memref<64x128xbf16, #tpu.memory_space<vmem>>, vector<64x128xbf16>
    %cst_101 = arith.constant dense<0.000000e+00> : vector<2x128xf32>
    %391 = tpu.matmul %389, %390, %cst_101 {dimension_numbers = #tpu.dot_dimension_numbers<[1], [0], [0], [1], [0, 0, 1, 1], [], []>} : vector<2x64xbf16>, vector<64x128xbf16>, vector<2x128xf32> -> vector<2x128xf32>
    %c0_102 = arith.constant 0 : index
    %c0_103 = arith.constant 0 : index
    %392 = vector.load %arg6[%c0_102, %c0_103] : memref<1x128xf32, #tpu.memory_space<vmem>>, vector<1x128xf32>
    %393 = vector.broadcast %392 : vector<1x128xf32> to vector<2x128xf32>
    %394 = arith.addf %391, %393 : vector<2x128xf32>
    %c0_104 = arith.constant 0 : index
    %c0_105 = arith.constant 0 : index
    %395 = vector.load %arg7[%c0_104, %c0_105] : memref<2x128xf32, #tpu.memory_space<vmem>>, vector<2x128xf32>
    tpu.vector_store %arg7[%c0_104, %c0_105], %394 {strides = array<i32>} : memref<2x128xf32, #tpu.memory_space<vmem>>, vector<2x128xf32>,
    return
  }
}

</mosaic_0001>

<bundles_post_ra>
// kernel: tpu_custom_call.1
= control target key start
LH: loop header
LB: loop body
LE: loop exit
PB: predicated region body
PF: predicated region fallthrough
CT: control target
= control target key end

     0   :  { %12 = vsyncpa [#allocation3], 0  ;;  %s3013_s0 = inlined_call_operand.hbm [shape: f32[8,2,256], index: 0, kind: input, shape index: {}]   ;;  %s3014_s1 = inlined_call_operand.hbm [shape: bf16[64,256], index: 1, kind: input, shape index: {}]   ;;  %s3015_s2 = inlined_call_operand.hbm [shape: bf16[64,256], index: 2, kind: input, shape index: {}]   ;;  %s3016_s3 = inlined_call_operand.hbm [shape: bf16[64,256], index: 3, kind: input, shape index: {}]   ;;  %s3017_s4 = inlined_call_operand.vmem [shape: f32[1,256], index: 4, kind: input, shape index: {}]   ;;  %s3018_s5 = inlined_call_operand.hbm [shape: bf16[64,128], index: 5, kind: input, shape index: {}]   ;;  %s3019_s6 = inlined_call_operand.vmem [shape: f32[1,128], index: 6, kind: input, shape index: {}]   ;;  %s3020_s7 = inlined_call_operand.hbm [shape: f32[2,128], index: 7, kind: output, shape index: {}]  }
   0x1   :  { %13 = vsyncpa [#allocation6], 0 }
   0x2   :  { %14 = vsyncpa [#allocation9], 0 }
   0x3   :  { %15 = vsyncpa [#allocation4], 0  ;;  %s2408_s24 = smov [#allocation5]  }
   0x4   :  { %s33_s25 = sshll.u32 %s2408_s24, 4  ;;  %s34_s25 = int_to_ptr.vmem [resolvable:$true] %s33_s25 }
   0x5   :  { %s2288_s26 = scalar_lea.vmem %s34_s25, 1024  ;;  %p2293_p1 = scmp.lt.s32.totalorder %s34_s25, %s34_s25 }
   0x6   :  { %p2289_p0 = scmp.ne.s32.totalorder %s34_s25, %s2288_s26  ;;  %p2294_p2 = scmp.lt.s32.totalorder %s2288_s26, %s2288_s26 }
   0x8   :  { %p2295_p3 = por %p2294_p2, %p2293_p1 }
   0xa   :  { %p2296_p4 = pnand %p2295_p3, %p2289_p0 }
   0xc   :  { %2299 = shalt.err (!%p2296_p4)
}
   0xd   :  { %s2409_s27 = smov 128   ;;  %s2410_s28 = smov 8  }
   0xe   :  { %39 = dma.hbm_to_vmem [thread:$0]  %s3014_s1, 1024, %s34_s25, [#allocation6], %s2409_s27, %s2409_s27, %s2410_s28  }
   0xf   :  { %s2411_s8 = smov [#allocation8]   ;;  %s2412_s10 = smov [#allocation2]  }
  0x10   :  { %s57_s9 = sshll.u32 %s2411_s8, 4  ;;  %s21_s11 = sshll.u32 %s2412_s10, 4  ;;  %s58_s9 = int_to_ptr.vmem [resolvable:$true] %s57_s9  ;;  %s22_s11 = int_to_ptr.vmem [resolvable:$true] %s21_s11 }
  0x11   :  { %s2308_s12 = scalar_lea.vmem %s58_s9, 1024  ;;  %p2313_p6 = scmp.lt.s32.totalorder %s58_s9, %s58_s9 }
  0x12   :  { %p2309_p5 = scmp.ne.s32.totalorder %s58_s9, %s2308_s12  ;;  %p2314_p7 = scmp.lt.s32.totalorder %s2308_s12, %s2308_s12 }
  0x14   :  { %p2315_p8 = por %p2314_p7, %p2313_p6 }
  0x16   :  { %p2316_p9 = pnand %p2315_p8, %p2309_p5 }
  0x18   :  { %2319 = shalt.err (!%p2316_p9)
}
  0x19   :  { %63 = dma.hbm_to_vmem [thread:$0]  %s3016_s3, 1024, %s58_s9, [#allocation9], %s2409_s27, %s2409_s27, %s2410_s28  }
  0x1a   :  { %s2328_s1 = scalar_lea.vmem %s22_s11, 512  ;;  %p2333_p11 = scmp.lt.s32.totalorder %s22_s11, %s22_s11 }
  0x1b   :  { %p2329_p10 = scmp.ne.s32.totalorder %s22_s11, %s2328_s1  ;;  %p2334_p12 = scmp.lt.s32.totalorder %s2328_s1, %s2328_s1 }
  0x1d   :  { %p2335_p13 = por %p2334_p12, %p2333_p11 }
  0x1f   :  { %p2336_p0 = pnand %p2335_p13, %p2329_p10 }
  0x21   :  { %2339 = shalt.err (!%p2336_p0)
}
  0x22   :  { %s2413_s15 = smov 64   ;;  %s2414_s16 = smov 4  }
  0x23   :  { %27 = dma.hbm_to_vmem [thread:$0]  %s3013_s0, 512, %s22_s11, [#allocation3], %s2413_s15, %s2413_s15, %s2414_s16  }
  0x24   :  { %s2415_s19 = smov [#allocation7]   ;;  %s2416_s3 = smov [#allocation10]  }
  0x25   :  { %s45_s20 = sshll.u32 %s2415_s19, 4  ;;  %s71_s21 = sshll.u32 %s2416_s3, 4  ;;  %s46_s20 = int_to_ptr.vmem [resolvable:$true] %s45_s20  ;;  %s72_s21 = int_to_ptr.vmem [resolvable:$true] %s71_s21 }
  0x26   :  { %s2348_s22 = scalar_lea.vmem %s46_s20, 1024  ;;  %p2353_p2 = scmp.lt.s32.totalorder %s46_s20, %s46_s20 }
  0x27   :  { %p2349_p1 = scmp.ne.s32.totalorder %s46_s20, %s2348_s22  ;;  %p2354_p3 = scmp.lt.s32.totalorder %s2348_s22, %s2348_s22 }
  0x29   :  { %p2355_p4 = por %p2354_p3, %p2353_p2 }
  0x2b   :  { %p2356_p5 = pnand %p2355_p4, %p2349_p1 }
  0x2d   :  { %2359 = shalt.err (!%p2356_p5)
}
  0x2e   :  { %51 = dma.hbm_to_vmem [thread:$0]  %s3015_s2, 1024, %s46_s20, [#allocation6], %s2409_s27, %s2409_s27, %s2410_s28  }
  0x2f   :  { %s2368_s0 = scalar_lea.vmem %s72_s21, 512  ;;  %p2373_p7 = scmp.lt.s32.totalorder %s72_s21, %s72_s21 }
  0x30   :  { %p2369_p6 = scmp.ne.s32.totalorder %s72_s21, %s2368_s0  ;;  %p2374_p8 = scmp.lt.s32.totalorder %s2368_s0, %s2368_s0 }
  0x32   :  { %p2375_p9 = por %p2374_p8, %p2373_p7 }
  0x34   :  { %p2376_p10 = pnand %p2375_p9, %p2369_p6 }
  0x36   :  { %2379 = shalt.err (!%p2376_p10)
}
  0x37   :  { %77 = dma.hbm_to_vmem [thread:$0]  %s3018_s5, 512, %s72_s21, [#allocation9], %s2413_s15, %s2413_s15, %s2414_s16  }
  0x38   :  { %2400 = dma.done.wait [#allocation3], 512  }
  0x39   :  { %2401 = vsyncadd [#allocation3], 4294966784 }
  0x3a   :  { %2402 = dma.done.wait [#allocation6], 2048  }
  0x3b   :  { %2403 = vsyncadd [#allocation6], 4294965248 }
  0x3c   :  { %2404 = dma.done.wait [#allocation9], 1536  }
  0x3d   :  { %2405 = vsyncadd [#allocation9], 4294965760  ;;  %v2417_v0 = vmov 0   ;;  %v2492_v1 = vld [vmem:[#allocation5 + $0x34] ss:$8 sps:$4 sm:$0xff]   ;;  %v122_v9 = vlaneseq  ;;  %vm178_vm1 = vcmask 523264  }
  0x3e   :  { %214 = vmatprep.mubr.bf16.mxu0 %v2417_v0  ;;  %353 = vmatprep.mubr.bf16.mxu1 %v2417_v0  ;;  %v2494_v2 = vld [vmem:[#allocation5 + $0x30] ss:$8 sps:$4 sm:$0xff]   ;;  %v2497_v3 = vld [vmem:[#allocation5 + $0x24] ss:$8 sps:$4 sm:$0xff]   ;;  %v2500_v4 = vld [vmem:[#allocation5 + $0x20] ss:$8 sps:$4 sm:$0xff]  }
  0x3f   :  { %190 = vmatprep.subr.bf16.mxu0 %v2492_v1  ;;  %v2503_v5 = vld [vmem:[#allocation5 + $0x14] ss:$8 sps:$4 sm:$0xff]   ;;  %v2505_v6 = vld [vmem:[#allocation5 + $0x10] ss:$8 sps:$4 sm:$0xff]   ;;  %v2507_v7 = vld [vmem:[#allocation5 + $0x4] ss:$8 sps:$4 sm:$0xff]  }
  0x40   :  { %191 = vmatpush1.bf16.msra.mxu0 %v2494_v2  ;;  %v2511_v8 = vld [vmem:[#allocation5] ss:$8 sps:$4 sm:$0xff]   ;;  %v2418_v10 = vmov 1983009808   ;;  %v2518_v12 = vshrl.u32 %v122_v9, 7  ;;  %v133_v20 = vand.u32 127, %v122_v9 }
  0x41   :  { %192 = vmatprep.subr.bf16.mxu0 %v2497_v3  ;;  %v227_v11 = vunpack.c.l.s4 %v2418_v10  ;;  %v137_v18 = vld [vmem:[#allocation2] sm:$0xf]  ;;  %v2531_v31 = vld [vmem:[#allocation7 + $0x34] ss:$8 sps:$4 sm:$0xff]   ;;  %v2533_v33 = vld [vmem:[#allocation7 + $0x30] ss:$8 sps:$4 sm:$0xff]  }
  0x42   :  { %v2524_v24 = vadd.s32 128, %v133_v20  ;;  %v2535_v34 = vld [vmem:[#allocation8 + $0x34] ss:$8 sps:$4 sm:$0xff]   ;;  %v2537_v35 = vld [vmem:[#allocation8 + $0x30] ss:$8 sps:$4 sm:$0xff]   ;;  %329 = vmatprep.subr.bf16.mxu1 %v2531_v31  ;;  %v124_v10 = vsub.s32 0, %v2518_v12 }
  0x43   :  { %v228_v13 = vunpack.c.0.s8 %v227_v11  ;;  %v2540_v36 = vld [vmem:[#allocation7 + $0x24] ss:$8 sps:$4 sm:$0xff]   ;;  %330 = vmatpush1.bf16.msra.mxu1 %v2533_v33  ;;  %v2544_v37 = vld [vmem:[#allocation7 + $0x20] ss:$8 sps:$4 sm:$0xff]   ;;  %v2552_v42 = vld [vmem:[#allocation7 + $0x14] ss:$8 sps:$4 sm:$0xff]  }
  0x44   :  { %193 = vmatpush1.bf16.msra.mxu0 %v2500_v4  ;;  %vm136_vm0 = vcmp.ge.s32.totalorder %v2524_v24, 192  ;;  %v2546_v38 = vld [vmem:[#allocation8 + $0x24] ss:$8 sps:$4 sm:$0xff]   ;;  %331 = vmatprep.subr.bf16.mxu1 %v2540_v36  ;;  %v2550_v41 = vld [vmem:[#allocation8 + $0x20] ss:$8 sps:$4 sm:$0xff]   ;;  %vm2420_vm2 = vmmov 0  }
  0x45   :  { %194 = vmatprep.subr.bf16.mxu0 %v2503_v5  ;;  %v2521_v15 = vsub.s32 %v228_v13, %v2518_v12  ;;  %v2555_v44 = vld [vmem:[#allocation8 + $0x14] ss:$8 sps:$4 sm:$0xff]   ;;  %v2558_v46 = vld [vmem:[#allocation7 + $0x10] ss:$8 sps:$4 sm:$0xff]   ;;  %v2567_v50 = vld [vmem:[#allocation7 + $0x4] ss:$8 sps:$4 sm:$0xff]  }
  0x46   :  { %v2562_v48 = vld [vmem:[#allocation8 + $0x10] ss:$8 sps:$4 sm:$0xff]   ;;  %v2569_v51 = vld [vmem:[#allocation8 + $0x4] ss:$8 sps:$4 sm:$0xff]   ;;  %v2572_v53 = vld [vmem:[#allocation7] ss:$8 sps:$4 sm:$0xff]  }
  0x47   :  { %332 = vmatpush1.bf16.msra.mxu1 %v2544_v37  ;;  %v2576_v54 = vld [vmem:[#allocation8] ss:$8 sps:$4 sm:$0xff]   ;;  %v128_v13 = vsub.s32 1, %v2518_v12  ;;  %s2421_s28 = smov [#allocation11]  }
  0x48   :  { %195 = vmatpush1.bf16.msra.mxu0 %v2505_v6  ;;  %333 = vmatprep.subr.bf16.mxu1 %v2552_v42  ;;  %v120_v11 = vld [vmem:[%s3017_s4] sm:$0x3]  ;;  %s2026_s29 = sshll.u32 %s2421_s28, 4  ;;  %s2027_s29 = int_to_ptr.vmem [resolvable:$true] %s2026_s29 }
  0x49   :  { %196 = vmatprep.subr.bf16.mxu0 %v2507_v7  ;;  %v2083_v24 = vld [vmem:[%s3019_s6] ss:$0 sm:$0xff]  ;;  %s2380_s30 = scalar_lea.vmem %s2027_s29, 32  ;;  %p2385_p12 = scmp.lt.s32.totalorder %s2027_s29, %s2027_s29 }
  0x4a   :  { %p2381_p11 = scmp.ne.s32.totalorder %s2027_s29, %s2380_s30  ;;  %p2386_p13 = scmp.lt.s32.totalorder %s2380_s30, %s2380_s30 }
  0x4b   :  { %334 = vmatpush1.bf16.msra.mxu1 %v2558_v46 }
  0x4c   :  { %197 = vmatpush1.bf16.msra.mxu0 %v2511_v8  ;;  %335 = vmatprep.subr.bf16.mxu1 %v2567_v50  ;;  %p2387_p0 = por %p2386_p13, %p2385_p12 }
  0x4d   :  { %410 = vmatprep.subr.bf16.mxu0 %v2535_v34 }
  0x4e   :  { %p2388_p1 = pnand %p2387_p0, %p2381_p11 }
  0x4f   :  { %215 = vmatmul.mubr.bf16.vlgmr.msra.gmra.mxu0 %v2417_v0  ;;  %336 = vmatpush1.bf16.msra.mxu1 %v2572_v53 }
  0x50   :  { %434 = vmatprep.mubr.bf16.mxu0 %v2417_v0  ;;  %411 = vmatpush1.bf16.msra.mxu0 %v2537_v35 }
  0x51   :  { %412 = vmatprep.subr.bf16.mxu0 %v2546_v38  ;;  %477 = vmatprep.subr.bf16.mxu1 %v2492_v1 }
  0x54   :  { %413 = vmatpush1.bf16.msra.mxu0 %v2550_v41 }
  0x55   :  { %414 = vmatprep.subr.bf16.mxu0 %v2555_v44 }
  0x58   :  { %415 = vmatpush1.bf16.msra.mxu0 %v2562_v48 }
  0x59   :  { %416 = vmatprep.subr.bf16.mxu0 %v2569_v51 }
  0x5c   :  { %417 = vmatpush1.bf16.msra.mxu0 %v2576_v54 }
  0x5d   :  { %576 = vmatprep.subr.bf16.mxu0 %v2531_v31 }
  0x5f   :  { %435 = vmatmul.mubr.bf16.vlgmr.msra.gmra.mxu0 %v2417_v0 }
  0x60   :  { %577 = vmatpush1.bf16.msra.mxu0 %v2533_v33  ;;  %600 = vmatprep.mubr.bf16.mxu0 %v2417_v0 }
  0x61   :  { %578 = vmatprep.subr.bf16.mxu0 %v2540_v36 }
  0x64   :  { %579 = vmatpush1.bf16.msra.mxu0 %v2544_v37 }
  0x65   :  { %580 = vmatprep.subr.bf16.mxu0 %v2552_v42 }
  0x68   :  { %581 = vmatpush1.bf16.msra.mxu0 %v2558_v46 }
  0x69   :  { %582 = vmatprep.subr.bf16.mxu0 %v2567_v50 }
  0x6c   :  { %583 = vmatpush1.bf16.msra.mxu0 %v2572_v53 }
  0x6d   :  { %687 = vmatprep.subr.bf16.mxu0 %v2492_v1 }
 0x10f   :  { %v216_v14 = vpop.f32.mrf.mxu0 }
 0x111   :  { %v218_v16 = vpop.f32.mrf.mxu0 }
 0x112   :  { %v225_v17 = vcombine.low %v216_v14, %v218_v16  ;;  %v2622_v14 = vrot.slane %v120_v11, %v124_v10 }
 0x113   :  { %v220_v19 = vpop.f32.mrf.mxu0 }
 0x114   :  { %v232_v21 = vrot.slane %v225_v17, %v2521_v15 }
 0x115   :  { %v221_v22 = vpop.f32.mrf.mxu0 }
 0x116   :  { %v234_v23 = vadd.f32 %v232_v21, %v137_v18  ;;  %v2624_v18 = vrot.slane %v120_v11, %v128_v13 }
 0x118   :  { %v235_v25 = vmul.f32 0.5, %v234_v23  ;;  %v243_v26 = vrot.slane %v234_v23, %v2521_v15 }
 0x11a   :  { %v254_v27 = vrot.slane %v235_v25, %v2521_v15  ;;  %v244_v28 = vcombine.high %v243_v26, %v243_v26 }
 0x11c   :  { %v255_v29 = vcombine.high %v254_v27, %v254_v27  ;;  %2160 = vtanh.f32 %v254_v27 }
 0x11e   :  { %v259_v30 = vsel %vm136_vm0, %v244_v28, %v255_v29 }
 0x11f   :  { %2162 = vtanh.f32 %v259_v30  ;;  %v436_v61 = vpop.f32.mrf.mxu0 }
 0x121   :  { %v438_v62 = vpop.f32.mrf.mxu0 }
 0x123   :  { %v440_v63 = vpop.f32.mrf.mxu0 }
 0x125   :  { %v441_v9 = vpop.f32.mrf.mxu0 }
 0x129   :  { %v2161_v32 = vpop.eup %2160 }
 0x12a   :  { %v262_v40 = vmul.f32 0.5, %v2161_v32 }
 0x12c   :  { %v2163_v39 = vpop.eup %2162  ;;  %v264_v47 = vadd.f32 0.5, %v262_v40 }
 0x12d   :  { %v263_v43 = vmul.f32 0.5, %v2163_v39 }
 0x12e   :  { %v268_v55 = vmul.f32 0.0, %v264_v47 }
 0x12f   :  { %v265_v45 = vadd.f32 0.5, %v263_v43 }
 0x131   :  { %v267_v49 = vsel %vm136_vm0, %v2163_v39, %v265_v45  ;;  %v468_v39 = vld [vmem:[#allocation2 + $0x4] sm:$0xf] }
 0x132   :  { %v269_v52 = vmul.f32 %v267_v49, %v264_v47 }
 0x134   :  { %271 = vrot.lane.b32.xlu0 %v269_v52, %s2413_s15 }
 0x1a6   :  { %v272_v56 = vpop.permute.xlu0 %271 }
 0x1a7   :  { %v2594_v57 = vadd.f32 %v272_v56, %v268_v55 }
 0x1a9   :  { %2164 = vtanh.f32 %v2594_v57 }
 0x1b6   :  { %v2165_v58 = vpop.eup %2164 }
 0x1b7   :  { %v276_v59 = vmul.f32 %v2165_v58, %v267_v49 }
 0x1b9   :  { %v277_v60 = vpack.c.bf16 %v276_v59, %v276_v59 }
 0x1bb   :  { %2053 = vmatmul.mubr.msk.bf16.vlgmr.msra.gmra.mxu1 %vm178_vm1, %v277_v60 }
 0x1bc   :  { %478 = vmatpush1.bf16.msra.mxu1 %v2494_v2  ;;  %501 = vmatprep.mubr.bf16.mxu1 %v2417_v0 }
 0x1bd   :  { %479 = vmatprep.subr.bf16.mxu1 %v2497_v3 }
 0x1c0   :  { %480 = vmatpush1.bf16.msra.mxu1 %v2500_v4 }
 0x1c1   :  { %481 = vmatprep.subr.bf16.mxu1 %v2503_v5 }
 0x1c4   :  { %482 = vmatpush1.bf16.msra.mxu1 %v2505_v6 }
 0x1c5   :  { %483 = vmatprep.subr.bf16.mxu1 %v2507_v7 }
 0x1c8   :  { %484 = vmatpush1.bf16.msra.mxu1 %v2511_v8 }
 0x1c9   :  { %620 = vmatprep.subr.bf16.mxu1 %v2535_v34 }
 0x1cb   :  { %2062 = vmatmul.mubr.msk.bf16.vlgmr.msra.gmra.mxu1 %vm178_vm1, %v277_v60 }
 0x1cc   :  { %621 = vmatpush1.bf16.msra.mxu1 %v2537_v35  ;;  %644 = vmatprep.mubr.bf16.mxu1 %v2417_v0 }
 0x1cd   :  { %622 = vmatprep.subr.bf16.mxu1 %v2546_v38 }
 0x1d0   :  { %623 = vmatpush1.bf16.msra.mxu1 %v2550_v41 }
 0x1d1   :  { %624 = vmatprep.subr.bf16.mxu1 %v2555_v44 }
 0x1d4   :  { %625 = vmatpush1.bf16.msra.mxu1 %v2562_v48 }
 0x1d5   :  { %626 = vmatprep.subr.bf16.mxu1 %v2569_v51 }
 0x1d8   :  { %627 = vmatpush1.bf16.msra.mxu1 %v2576_v54 }
 0x1d9   :  { %786 = vmatprep.subr.bf16.mxu1 %v2531_v31 }
 0x27b   :  { %v355_v16 = vpop.f32.mrf.mxu1 }
 0x27c   :  { %v437_v17 = vadd.f32 %v436_v61, %v355_v16 }
 0x27d   :  { %v357_v19 = vpop.f32.mrf.mxu1 }
 0x27e   :  { %v443_v20 = vadd.f32 %v437_v17, %v2622_v14  ;;  %v439_v21 = vadd.f32 %v438_v62, %v357_v19 }
 0x27f   :  { %v359_v22 = vpop.f32.mrf.mxu1 }
 0x280   :  { %v445_v23 = vmul.f32 0.5, %v443_v20  ;;  %v444_v25 = vadd.f32 %v439_v21, %v2624_v18 }
 0x281   :  { %v360_v26 = vpop.f32.mrf.mxu1 }
 0x282   :  { %2166 = vtanh.f32 %v445_v23  ;;  %v446_v27 = vmul.f32 0.5, %v444_v25 }
 0x284   :  { %v448_v12 = vsel %vm136_vm0, %v444_v25, %v446_v27 }
 0x285   :  { %2168 = vtanh.f32 %v448_v12 }
 0x28b   :  { %v503_v28 = vpop.f32.mrf.mxu1 }
 0x28d   :  { %v505_v29 = vpop.f32.mrf.mxu1 }
 0x28e   :  { %v512_v30 = vcombine.low %v503_v28, %v505_v29 }
 0x28f   :  { %v2167_v32 = vpop.eup %2166  ;;  %v507_v40 = vpop.f32.mrf.mxu1 }
 0x290   :  { %v519_v43 = vrot.slane %v512_v30, %v2521_v15  ;;  %v451_v52 = vmul.f32 0.5, %v2167_v32 }
 0x291   :  { %v508_v45 = vpop.f32.mrf.mxu1 }
 0x292   :  { %v2169_v47 = vpop.eup %2168  ;;  %v521_v49 = vadd.f32 %v519_v43, %v468_v39  ;;  %v453_v61 = vadd.f32 0.5, %v451_v52 }
 0x293   :  { %v452_v55 = vmul.f32 0.5, %v2169_v47 }
 0x294   :  { %v522_v56 = vmul.f32 0.5, %v521_v49  ;;  %v530_v58 = vrot.slane %v521_v49, %v2521_v15  ;;  %v457_v25 = vmul.f32 0.0, %v453_v61 }
 0x295   :  { %v454_v59 = vadd.f32 0.5, %v452_v55 }
 0x296   :  { %v541_v60 = vrot.slane %v522_v56, %v2521_v15  ;;  %v531_v63 = vcombine.high %v530_v58, %v530_v58 }
 0x297   :  { %v456_v62 = vsel %vm136_vm0, %v2169_v47, %v454_v59 }
 0x298   :  { %v542_v9 = vcombine.high %v541_v60, %v541_v60  ;;  %v458_v10 = vmul.f32 %v456_v62, %v453_v61  ;;  %2170 = vtanh.f32 %v541_v60 }
 0x29a   :  { %v546_v11 = vsel %vm136_vm0, %v531_v63, %v542_v9  ;;  %460 = vrot.lane.b32.xlu1 %v458_v10, %s2413_s15 }
 0x29b   :  { %2172 = vtanh.f32 %v546_v11 }
 0x2a5   :  { %v2171_v13 = vpop.eup %2170 }
 0x2a6   :  { %v549_v17 = vmul.f32 0.5, %v2171_v13 }
 0x2a8   :  { %v2173_v16 = vpop.eup %2172  ;;  %v551_v21 = vadd.f32 0.5, %v549_v17 }
 0x2a9   :  { %v550_v19 = vmul.f32 0.5, %v2173_v16 }
 0x2aa   :  { %v555_v30 = vmul.f32 %v551_v21, %v2594_v57 }
 0x2ab   :  { %v552_v20 = vadd.f32 0.5, %v550_v19 }
 0x2ad   :  { %v554_v22 = vsel %vm136_vm0, %v2173_v16, %v552_v20  ;;  %v678_v20 = vld [vmem:[#allocation2 + $0x8] sm:$0xf] }
 0x2ae   :  { %v556_v23 = vmul.f32 %v554_v22, %v551_v21 }
 0x2b0   :  { %558 = vrot.lane.b32.xlu0 %v556_v23, %s2413_s15 }
 0x30c   :  { %v461_v26 = vpop.permute.xlu1 %460 }
 0x30d   :  { %v2641_v27 = vadd.f32 %v461_v26, %v457_v25 }
 0x30f   :  { %2174 = vtanh.f32 %v2641_v27 }
 0x31c   :  { %v2175_v12 = vpop.eup %2174 }
 0x31d   :  { %v465_v28 = vmul.f32 %v2175_v12, %v456_v62 }
 0x31f   :  { %v466_v29 = vpack.c.bf16 %v465_v28, %v465_v28 }
 0x321   :  { %2064 = vmatmul.mubr.msk.bf16.vlgmr.msra.gmra.mxu1 %vm178_vm1, %v466_v29 }
 0x322   :  { %v559_v32 = vpop.permute.xlu0 %558  ;;  %787 = vmatpush1.bf16.msra.mxu1 %v2533_v33  ;;  %810 = vmatprep.mubr.bf16.mxu1 %v2417_v0 }
 0x323   :  { %v2648_v39 = vadd.f32 %v559_v32, %v555_v30  ;;  %788 = vmatprep.subr.bf16.mxu1 %v2540_v36 }
 0x325   :  { %2176 = vtanh.f32 %v2648_v39 }
 0x326   :  { %789 = vmatpush1.bf16.msra.mxu1 %v2544_v37 }
 0x327   :  { %790 = vmatprep.subr.bf16.mxu1 %v2552_v42 }
 0x32a   :  { %791 = vmatpush1.bf16.msra.mxu1 %v2558_v46 }
 0x32b   :  { %792 = vmatprep.subr.bf16.mxu1 %v2567_v50 }
 0x32e   :  { %793 = vmatpush1.bf16.msra.mxu1 %v2572_v53 }
 0x32f   :  { %897 = vmatprep.subr.bf16.mxu1 %v2492_v1 }
 0x332   :  { %v2177_v57 = vpop.eup %2176 }
 0x333   :  { %v563_v40 = vmul.f32 %v2177_v57, %v554_v22 }
 0x335   :  { %v564_v43 = vpack.c.bf16 %v563_v40, %v563_v40 }
 0x337   :  { %2063 = vmatmul.mubr.msk.bf16.vlgmr.msra.gmra.mxu0 %vm178_vm1, %v564_v43 }
 0x338   :  { %688 = vmatpush1.bf16.msra.mxu0 %v2494_v2  ;;  %711 = vmatprep.mubr.bf16.mxu0 %v2417_v0 }
 0x339   :  { %689 = vmatprep.subr.bf16.mxu0 %v2497_v3 }
 0x33c   :  { %690 = vmatpush1.bf16.msra.mxu0 %v2500_v4 }
 0x33d   :  { %691 = vmatprep.subr.bf16.mxu0 %v2503_v5 }
 0x340   :  { %692 = vmatpush1.bf16.msra.mxu0 %v2505_v6 }
 0x341   :  { %693 = vmatprep.subr.bf16.mxu0 %v2507_v7 }
 0x344   :  { %694 = vmatpush1.bf16.msra.mxu0 %v2511_v8 }
 0x345   :  { %830 = vmatprep.subr.bf16.mxu0 %v2535_v34 }
 0x347   :  { %2065 = vmatmul.mubr.msk.bf16.vlgmr.msra.gmra.mxu0 %vm178_vm1, %v564_v43 }
 0x348   :  { %831 = vmatpush1.bf16.msra.mxu0 %v2537_v35  ;;  %854 = vmatprep.mubr.bf16.mxu0 %v2417_v0 }
 0x349   :  { %832 = vmatprep.subr.bf16.mxu0 %v2546_v38 }
 0x34c   :  { %833 = vmatpush1.bf16.msra.mxu0 %v2550_v41 }
 0x34d   :  { %834 = vmatprep.subr.bf16.mxu0 %v2555_v44 }
 0x350   :  { %835 = vmatpush1.bf16.msra.mxu0 %v2562_v48 }
 0x351   :  { %836 = vmatprep.subr.bf16.mxu0 %v2569_v51 }
 0x354   :  { %837 = vmatpush1.bf16.msra.mxu0 %v2576_v54 }
 0x355   :  { %996 = vmatprep.subr.bf16.mxu0 %v2531_v31 }
 0x3e1   :  { %v646_v45 = vpop.f32.mrf.mxu1 }
 0x3e3   :  { %v648_v47 = vpop.f32.mrf.mxu1 }
 0x3e5   :  { %v650_v49 = vpop.f32.mrf.mxu1 }
 0x3e7   :  { %v651_v52 = vpop.f32.mrf.mxu1 }
 0x3f7   :  { %v602_v55 = vpop.f32.mrf.mxu0 }
 0x3f8   :  { %v647_v56 = vadd.f32 %v646_v45, %v602_v55 }
 0x3f9   :  { %v604_v58 = vpop.f32.mrf.mxu0 }
 0x3fa   :  { %v653_v59 = vadd.f32 %v647_v56, %v2622_v14  ;;  %v649_v60 = vadd.f32 %v648_v47, %v604_v58 }
 0x3fb   :  { %v606_v61 = vpop.f32.mrf.mxu0 }
 0x3fc   :  { %v655_v62 = vmul.f32 0.5, %v653_v59  ;;  %v654_v63 = vadd.f32 %v649_v60, %v2624_v18 }
 0x3fd   :  { %v607_v9 = vpop.f32.mrf.mxu0 }
 0x3fe   :  { %2178 = vtanh.f32 %v655_v62  ;;  %v656_v10 = vmul.f32 0.5, %v654_v63 }
 0x400   :  { %v658_v11 = vsel %vm136_vm0, %v654_v63, %v656_v10 }
 0x401   :  { %2180 = vtanh.f32 %v658_v11 }
 0x407   :  { %v713_v13 = vpop.f32.mrf.mxu0 }
 0x409   :  { %v715_v16 = vpop.f32.mrf.mxu0 }
 0x40a   :  { %v722_v17 = vcombine.low %v713_v13, %v715_v16 }
 0x40b   :  { %v2179_v19 = vpop.eup %2178  ;;  %v717_v21 = vpop.f32.mrf.mxu0 }
 0x40c   :  { %v729_v22 = vrot.slane %v722_v17, %v2521_v15  ;;  %v661_v12 = vmul.f32 0.5, %v2179_v19 }
 0x40d   :  { %v718_v23 = vpop.f32.mrf.mxu0 }
 0x40e   :  { %v2181_v25 = vpop.eup %2180  ;;  %v731_v26 = vadd.f32 %v729_v22, %v678_v20  ;;  %v663_v40 = vadd.f32 0.5, %v661_v12 }
 0x40f   :  { %v662_v28 = vmul.f32 0.5, %v2181_v25 }
 0x410   :  { %v732_v29 = vmul.f32 0.5, %v731_v26  ;;  %v740_v30 = vrot.slane %v731_v26, %v2521_v15  ;;  %v667_v9 = vmul.f32 %v663_v40, %v2641_v27 }
 0x411   :  { %v664_v32 = vadd.f32 0.5, %v662_v28 }
 0x412   :  { %v751_v57 = vrot.slane %v732_v29, %v2521_v15  ;;  %v741_v45 = vcombine.high %v740_v30, %v740_v30 }
 0x413   :  { %v666_v43 = vsel %vm136_vm0, %v2181_v25, %v664_v32 }
 0x414   :  { %v752_v47 = vcombine.high %v751_v57, %v751_v57  ;;  %v668_v49 = vmul.f32 %v666_v43, %v663_v40  ;;  %2182 = vtanh.f32 %v751_v57 }
 0x416   :  { %v756_v52 = vsel %vm136_vm0, %v741_v45, %v752_v47  ;;  %670 = vrot.lane.b32.xlu0 %v668_v49, %s2413_s15 }
 0x417   :  { %2184 = vtanh.f32 %v756_v52 }
 0x421   :  { %v2183_v55 = vpop.eup %2182 }
 0x422   :  { %v759_v58 = vmul.f32 0.5, %v2183_v55 }
 0x424   :  { %v2185_v56 = vpop.eup %2184  ;;  %v761_v61 = vadd.f32 0.5, %v759_v58 }
 0x425   :  { %v760_v59 = vmul.f32 0.5, %v2185_v56 }
 0x426   :  { %v765_v19 = vmul.f32 %v761_v61, %v2648_v39 }
 0x427   :  { %v762_v60 = vadd.f32 0.5, %v760_v59 }
 0x429   :  { %v764_v62 = vsel %vm136_vm0, %v2185_v56, %v762_v60  ;;  %v888_v60 = vld [vmem:[#allocation2 + $0xc] sm:$0xf] }
 0x42a   :  { %v766_v63 = vmul.f32 %v764_v62, %v761_v61 }
 0x42c   :  { %768 = vrot.lane.b32.xlu1 %v766_v63, %s2413_s15 }
 0x488   :  { %v671_v10 = vpop.permute.xlu0 %670 }
 0x489   :  { %v2694_v11 = vadd.f32 %v671_v10, %v667_v9 }
 0x48b   :  { %2186 = vtanh.f32 %v2694_v11 }
 0x498   :  { %v2187_v13 = vpop.eup %2186 }
 0x499   :  { %v675_v16 = vmul.f32 %v2187_v13, %v666_v43 }
 0x49b   :  { %v676_v17 = vpack.c.bf16 %v675_v16, %v675_v16 }
 0x49d   :  { %2067 = vmatmul.mubr.msk.bf16.vlgmr.msra.gmra.mxu0 %vm178_vm1, %v676_v17 }
 0x49e   :  { %v769_v20 = vpop.permute.xlu1 %768  ;;  %997 = vmatpush1.bf16.msra.mxu0 %v2533_v33  ;;  %1020 = vmatprep.mubr.bf16.mxu0 %v2417_v0 }
 0x49f   :  { %v2701_v21 = vadd.f32 %v769_v20, %v765_v19  ;;  %998 = vmatprep.subr.bf16.mxu0 %v2540_v36 }
 0x4a1   :  { %2188 = vtanh.f32 %v2701_v21 }
 0x4a2   :  { %999 = vmatpush1.bf16.msra.mxu0 %v2544_v37 }
 0x4a3   :  { %1000 = vmatprep.subr.bf16.mxu0 %v2552_v42 }
 0x4a6   :  { %1001 = vmatpush1.bf16.msra.mxu0 %v2558_v46 }
 0x4a7   :  { %1002 = vmatprep.subr.bf16.mxu0 %v2567_v50 }
 0x4aa   :  { %1003 = vmatpush1.bf16.msra.mxu0 %v2572_v53 }
 0x4ab   :  { %1107 = vmatprep.subr.bf16.mxu0 %v2492_v1 }
 0x4ae   :  { %v2189_v27 = vpop.eup %2188 }
 0x4af   :  { %v773_v39 = vmul.f32 %v2189_v27, %v764_v62 }
 0x4b1   :  { %v774_v22 = vpack.c.bf16 %v773_v39, %v773_v39 }
 0x4b3   :  { %2066 = vmatmul.mubr.msk.bf16.vlgmr.msra.gmra.mxu1 %vm178_vm1, %v774_v22 }
 0x4b4   :  { %898 = vmatpush1.bf16.msra.mxu1 %v2494_v2  ;;  %921 = vmatprep.mubr.bf16.mxu1 %v2417_v0 }
 0x4b5   :  { %899 = vmatprep.subr.bf16.mxu1 %v2497_v3 }
 0x4b8   :  { %900 = vmatpush1.bf16.msra.mxu1 %v2500_v4 }
 0x4b9   :  { %901 = vmatprep.subr.bf16.mxu1 %v2503_v5 }
 0x4bc   :  { %902 = vmatpush1.bf16.msra.mxu1 %v2505_v6 }
 0x4bd   :  { %903 = vmatprep.subr.bf16.mxu1 %v2507_v7 }
 0x4c0   :  { %904 = vmatpush1.bf16.msra.mxu1 %v2511_v8 }
 0x4c1   :  { %1040 = vmatprep.subr.bf16.mxu1 %v2535_v34 }
 0x4c3   :  { %2068 = vmatmul.mubr.msk.bf16.vlgmr.msra.gmra.mxu1 %vm178_vm1, %v774_v22 }
 0x4c4   :  { %1041 = vmatpush1.bf16.msra.mxu1 %v2537_v35  ;;  %1064 = vmatprep.mubr.bf16.mxu1 %v2417_v0 }
 0x4c5   :  { %1042 = vmatprep.subr.bf16.mxu1 %v2546_v38 }
 0x4c8   :  { %1043 = vmatpush1.bf16.msra.mxu1 %v2550_v41 }
 0x4c9   :  { %1044 = vmatprep.subr.bf16.mxu1 %v2555_v44 }
 0x4cc   :  { %1045 = vmatpush1.bf16.msra.mxu1 %v2562_v48 }
 0x4cd   :  { %1046 = vmatprep.subr.bf16.mxu1 %v2569_v51 }
 0x4d0   :  { %1047 = vmatpush1.bf16.msra.mxu1 %v2576_v54 }
 0x4d1   :  { %1206 = vmatprep.subr.bf16.mxu1 %v2531_v31 }
 0x55d   :  { %v856_v23 = vpop.f32.mrf.mxu0 }
 0x55f   :  { %v858_v25 = vpop.f32.mrf.mxu0 }
 0x561   :  { %v860_v26 = vpop.f32.mrf.mxu0 }
 0x563   :  { %v861_v12 = vpop.f32.mrf.mxu0 }
 0x573   :  { %v812_v28 = vpop.f32.mrf.mxu1 }
 0x574   :  { %v857_v29 = vadd.f32 %v856_v23, %v812_v28 }
 0x575   :  { %v814_v30 = vpop.f32.mrf.mxu1 }
 0x576   :  { %v863_v32 = vadd.f32 %v857_v29, %v2622_v14  ;;  %v859_v57 = vadd.f32 %v858_v25, %v814_v30 }
 0x577   :  { %v816_v40 = vpop.f32.mrf.mxu1 }
 0x578   :  { %v865_v43 = vmul.f32 0.5, %v863_v32  ;;  %v864_v45 = vadd.f32 %v859_v57, %v2624_v18 }
 0x579   :  { %v817_v47 = vpop.f32.mrf.mxu1 }
 0x57a   :  { %2190 = vtanh.f32 %v865_v43  ;;  %v866_v49 = vmul.f32 0.5, %v864_v45 }
 0x57c   :  { %v868_v52 = vsel %vm136_vm0, %v864_v45, %v866_v49 }
 0x57d   :  { %2192 = vtanh.f32 %v868_v52 }
 0x583   :  { %v923_v55 = vpop.f32.mrf.mxu1 }
 0x585   :  { %v925_v56 = vpop.f32.mrf.mxu1 }
 0x586   :  { %v932_v58 = vcombine.low %v923_v55, %v925_v56 }
 0x587   :  { %v2191_v59 = vpop.eup %2190  ;;  %v927_v61 = vpop.f32.mrf.mxu1 }
 0x588   :  { %v939_v62 = vrot.slane %v932_v58, %v2521_v15  ;;  %v871_v13 = vmul.f32 0.5, %v2191_v59 }
 0x589   :  { %v928_v63 = vpop.f32.mrf.mxu1 }
 0x58a   :  { %v2193_v9 = vpop.eup %2192  ;;  %v941_v10 = vadd.f32 %v939_v62, %v888_v60  ;;  %v873_v39 = vadd.f32 0.5, %v871_v13 }
 0x58b   :  { %v872_v16 = vmul.f32 0.5, %v2193_v9 }
 0x58c   :  { %v942_v17 = vmul.f32 0.5, %v941_v10  ;;  %v950_v19 = vrot.slane %v941_v10, %v2521_v15  ;;  %v877_v47 = vmul.f32 %v873_v39, %v2694_v11 }
 0x58d   :  { %v874_v20 = vadd.f32 0.5, %v872_v16 }
 0x58e   :  { %v961_v27 = vrot.slane %v942_v17, %v2521_v15  ;;  %v951_v23 = vcombine.high %v950_v19, %v950_v19 }
 0x58f   :  { %v876_v22 = vsel %vm136_vm0, %v2193_v9, %v874_v20 }
 0x590   :  { %v962_v25 = vcombine.high %v961_v27, %v961_v27  ;;  %v878_v26 = vmul.f32 %v876_v22, %v873_v39  ;;  %2194 = vtanh.f32 %v961_v27 }
 0x592   :  { %v966_v12 = vsel %vm136_vm0, %v951_v23, %v962_v25  ;;  %880 = vrot.lane.b32.xlu0 %v878_v26, %s2413_s15 }
 0x593   :  { %2196 = vtanh.f32 %v966_v12  ;;  %v1098_v12 = vld [vmem:[#allocation2 + $0x10] sm:$0xf] }
 0x59d   :  { %v2195_v28 = vpop.eup %2194 }
 0x59e   :  { %v969_v30 = vmul.f32 0.5, %v2195_v28 }
 0x5a0   :  { %v2197_v29 = vpop.eup %2196  ;;  %v971_v40 = vadd.f32 0.5, %v969_v30 }
 0x5a1   :  { %v970_v32 = vmul.f32 0.5, %v2197_v29 }
 0x5a2   :  { %v975_v59 = vmul.f32 %v971_v40, %v2701_v21 }
 0x5a3   :  { %v972_v57 = vadd.f32 0.5, %v970_v32 }
 0x5a5   :  { %v974_v43 = vsel %vm136_vm0, %v2197_v29, %v972_v57 }
 0x5a6   :  { %v976_v45 = vmul.f32 %v974_v43, %v971_v40 }
 0x5a8   :  { %978 = vrot.lane.b32.xlu1 %v976_v45, %s2413_s15 }
 0x604   :  { %v881_v49 = vpop.permute.xlu0 %880 }
 0x605   :  { %v2747_v52 = vadd.f32 %v881_v49, %v877_v47 }
 0x607   :  { %2198 = vtanh.f32 %v2747_v52 }
 0x614   :  { %v2199_v55 = vpop.eup %2198 }
 0x615   :  { %v885_v56 = vmul.f32 %v2199_v55, %v876_v22 }
 0x617   :  { %v886_v58 = vpack.c.bf16 %v885_v56, %v885_v56 }
 0x619   :  { %2070 = vmatmul.mubr.msk.bf16.vlgmr.msra.gmra.mxu1 %vm178_vm1, %v886_v58 }
 0x61a   :  { %v979_v60 = vpop.permute.xlu1 %978  ;;  %1207 = vmatpush1.bf16.msra.mxu1 %v2533_v33  ;;  %1230 = vmatprep.mubr.bf16.mxu1 %v2417_v0 }
 0x61b   :  { %v2754_v61 = vadd.f32 %v979_v60, %v975_v59  ;;  %1208 = vmatprep.subr.bf16.mxu1 %v2540_v36 }
 0x61d   :  { %2200 = vtanh.f32 %v2754_v61 }
 0x61e   :  { %1209 = vmatpush1.bf16.msra.mxu1 %v2544_v37 }
 0x61f   :  { %1210 = vmatprep.subr.bf16.mxu1 %v2552_v42 }
 0x622   :  { %1211 = vmatpush1.bf16.msra.mxu1 %v2558_v46 }
 0x623   :  { %1212 = vmatprep.subr.bf16.mxu1 %v2567_v50 }
 0x626   :  { %1213 = vmatpush1.bf16.msra.mxu1 %v2572_v53 }
 0x627   :  { %1317 = vmatprep.subr.bf16.mxu1 %v2492_v1 }
 0x62a   :  { %v2201_v11 = vpop.eup %2200 }
 0x62b   :  { %v983_v21 = vmul.f32 %v2201_v11, %v974_v43 }
 0x62d   :  { %v984_v62 = vpack.c.bf16 %v983_v21, %v983_v21 }
 0x62f   :  { %2069 = vmatmul.mubr.msk.bf16.vlgmr.msra.gmra.mxu0 %vm178_vm1, %v984_v62 }
 0x630   :  { %1108 = vmatpush1.bf16.msra.mxu0 %v2494_v2  ;;  %1131 = vmatprep.mubr.bf16.mxu0 %v2417_v0 }
 0x631   :  { %1109 = vmatprep.subr.bf16.mxu0 %v2497_v3 }
 0x634   :  { %1110 = vmatpush1.bf16.msra.mxu0 %v2500_v4 }
 0x635   :  { %1111 = vmatprep.subr.bf16.mxu0 %v2503_v5 }
 0x638   :  { %1112 = vmatpush1.bf16.msra.mxu0 %v2505_v6 }
 0x639   :  { %1113 = vmatprep.subr.bf16.mxu0 %v2507_v7 }
 0x63c   :  { %1114 = vmatpush1.bf16.msra.mxu0 %v2511_v8 }
 0x63d   :  { %1250 = vmatprep.subr.bf16.mxu0 %v2535_v34 }
 0x63f   :  { %2071 = vmatmul.mubr.msk.bf16.vlgmr.msra.gmra.mxu0 %vm178_vm1, %v984_v62 }
 0x640   :  { %1251 = vmatpush1.bf16.msra.mxu0 %v2537_v35  ;;  %1274 = vmatprep.mubr.bf16.mxu0 %v2417_v0 }
 0x641   :  { %1252 = vmatprep.subr.bf16.mxu0 %v2546_v38 }
 0x644   :  { %1253 = vmatpush1.bf16.msra.mxu0 %v2550_v41 }
 0x645   :  { %1254 = vmatprep.subr.bf16.mxu0 %v2555_v44 }
 0x648   :  { %1255 = vmatpush1.bf16.msra.mxu0 %v2562_v48 }
 0x649   :  { %1256 = vmatprep.subr.bf16.mxu0 %v2569_v51 }
 0x64c   :  { %1257 = vmatpush1.bf16.msra.mxu0 %v2576_v54 }
 0x64d   :  { %1416 = vmatprep.subr.bf16.mxu0 %v2531_v31 }
 0x6d9   :  { %v1066_v1 = vpop.f32.mrf.mxu1 }
 0x6db   :  { %v1068_v2 = vpop.f32.mrf.mxu1 }
 0x6dd   :  { %v1070_v3 = vpop.f32.mrf.mxu1 }
 0x6df   :  { %v1071_v4 = vpop.f32.mrf.mxu1 }
 0x6ef   :  { %v1022_v5 = vpop.f32.mrf.mxu0 }
 0x6f0   :  { %v1067_v63 = vadd.f32 %v1066_v1, %v1022_v5 }
 0x6f1   :  { %v1024_v9 = vpop.f32.mrf.mxu0 }
 0x6f2   :  { %v1073_v10 = vadd.f32 %v1067_v63, %v2622_v14  ;;  %v1069_v13 = vadd.f32 %v1068_v2, %v1024_v9 }
 0x6f3   :  { %v1026_v16 = vpop.f32.mrf.mxu0 }
 0x6f4   :  { %v1075_v17 = vmul.f32 0.5, %v1073_v10  ;;  %v1074_v19 = vadd.f32 %v1069_v13, %v2624_v18 }
 0x6f5   :  { %v1027_v20 = vpop.f32.mrf.mxu0 }
 0x6f6   :  { %2202 = vtanh.f32 %v1075_v17  ;;  %v1076_v27 = vmul.f32 0.5, %v1074_v19 }
 0x6f8   :  { %v1078_v39 = vsel %vm136_vm0, %v1074_v19, %v1076_v27 }
 0x6f9   :  { %2204 = vtanh.f32 %v1078_v39 }
 0x6ff   :  { %v1133_v22 = vpop.f32.mrf.mxu0 }
 0x701   :  { %v1135_v23 = vpop.f32.mrf.mxu0 }
 0x702   :  { %v1142_v25 = vcombine.low %v1133_v22, %v1135_v23 }
 0x703   :  { %v2203_v26 = vpop.eup %2202  ;;  %v1137_v28 = vpop.f32.mrf.mxu0 }
 0x704   :  { %v1149_v29 = vrot.slane %v1142_v25, %v2521_v15  ;;  %v1081_v40 = vmul.f32 0.5, %v2203_v26 }
 0x705   :  { %v1138_v30 = vpop.f32.mrf.mxu0 }
 0x706   :  { %v2205_v32 = vpop.eup %2204  ;;  %v1151_v57 = vadd.f32 %v1149_v29, %v1098_v12  ;;  %v1083_v56 = vadd.f32 0.5, %v1081_v40 }
 0x707   :  { %v1082_v43 = vmul.f32 0.5, %v2205_v32 }
 0x708   :  { %v1152_v45 = vmul.f32 0.5, %v1151_v57  ;;  %v1160_v47 = vrot.slane %v1151_v57, %v2521_v15  ;;  %v1087_v10 = vmul.f32 %v1083_v56, %v2747_v52  ;;  %v2816_v52 = vld [vmem:[#allocation5 + $0x34] ss:$8 sps:$4 sm:$0xff]  }
 0x709   :  { %v1084_v49 = vadd.f32 0.5, %v1082_v43  ;;  %v1308_v57 = vld [vmem:[#allocation2 + $0x14] sm:$0xf] }
 0x70a   :  { %v1171_v55 = vrot.slane %v1152_v45, %v2521_v15  ;;  %v1161_v59 = vcombine.high %v1160_v47, %v1160_v47 }
 0x70b   :  { %v1086_v58 = vsel %vm136_vm0, %v2205_v32, %v1084_v49 }
 0x70c   :  { %v1172_v60 = vcombine.high %v1171_v55, %v1171_v55  ;;  %v1088_v11 = vmul.f32 %v1086_v58, %v1083_v56  ;;  %2206 = vtanh.f32 %v1171_v55 }
 0x70e   :  { %v1176_v21 = vsel %vm136_vm0, %v1161_v59, %v1172_v60  ;;  %1090 = vrot.lane.b32.xlu0 %v1088_v11, %s2413_s15 }
 0x70f   :  { %2208 = vtanh.f32 %v1176_v21 }
 0x719   :  { %v2207_v62 = vpop.eup %2206 }
 0x71a   :  { %v1179_v2 = vmul.f32 0.5, %v2207_v62 }
 0x71c   :  { %v2209_v1 = vpop.eup %2208  ;;  %v1181_v5 = vadd.f32 0.5, %v1179_v2 }
 0x71d   :  { %v1180_v3 = vmul.f32 0.5, %v2209_v1 }
 0x71e   :  { %v1185_v27 = vmul.f32 %v1181_v5, %v2754_v61 }
 0x71f   :  { %v1182_v4 = vadd.f32 0.5, %v1180_v3 }
 0x721   :  { %v1184_v63 = vsel %vm136_vm0, %v2209_v1, %v1182_v4 }
 0x722   :  { %v1186_v9 = vmul.f32 %v1184_v63, %v1181_v5 }
 0x724   :  { %1188 = vrot.lane.b32.xlu1 %v1186_v9, %s2413_s15 }
 0x780   :  { %v1091_v13 = vpop.permute.xlu0 %1090 }
 0x781   :  { %v2800_v16 = vadd.f32 %v1091_v13, %v1087_v10 }
 0x783   :  { %2210 = vtanh.f32 %v2800_v16 }
 0x790   :  { %v2211_v17 = vpop.eup %2210 }
 0x791   :  { %v1095_v19 = vmul.f32 %v2211_v17, %v1086_v58 }
 0x793   :  { %v1096_v20 = vpack.c.bf16 %v1095_v19, %v1095_v19 }
 0x795   :  { %2073 = vmatmul.mubr.msk.bf16.vlgmr.msra.gmra.mxu0 %vm178_vm1, %v1096_v20 }
 0x796   :  { %v1189_v39 = vpop.permute.xlu1 %1188  ;;  %1417 = vmatpush1.bf16.msra.mxu0 %v2533_v33  ;;  %1440 = vmatprep.mubr.bf16.mxu0 %v2417_v0 }
 0x797   :  { %v2807_v22 = vadd.f32 %v1189_v39, %v1185_v27  ;;  %1418 = vmatprep.subr.bf16.mxu0 %v2540_v36  ;;  %v2820_v36 = vld [vmem:[#allocation5 + $0x30] ss:$8 sps:$4 sm:$0xff]  }
 0x799   :  { %2212 = vtanh.f32 %v2807_v22 }
 0x79a   :  { %1419 = vmatpush1.bf16.msra.mxu0 %v2544_v37  ;;  %v2824_v37 = vld [vmem:[#allocation5 + $0x24] ss:$8 sps:$4 sm:$0xff]  }
 0x79b   :  { %1420 = vmatprep.subr.bf16.mxu0 %v2552_v42  ;;  %v2827_v42 = vld [vmem:[#allocation5 + $0x20] ss:$8 sps:$4 sm:$0xff]  }
 0x79e   :  { %1421 = vmatpush1.bf16.msra.mxu0 %v2558_v46  ;;  %v2830_v46 = vld [vmem:[#allocation5 + $0x14] ss:$8 sps:$4 sm:$0xff]  }
 0x79f   :  { %1422 = vmatprep.subr.bf16.mxu0 %v2567_v50 }
 0x7a2   :  { %1423 = vmatpush1.bf16.msra.mxu0 %v2572_v53 }
 0x7a3   :  { %1527 = vmatprep.subr.bf16.mxu0 %v2816_v52 }
 0x7a6   :  { %v2213_v33 = vpop.eup %2212 }
 0x7a7   :  { %v1193_v61 = vmul.f32 %v2213_v33, %v1184_v63 }
 0x7a9   :  { %v1194_v23 = vpack.c.bf16 %v1193_v61, %v1193_v61 }
 0x7ab   :  { %2072 = vmatmul.mubr.msk.bf16.vlgmr.msra.gmra.mxu1 %vm178_vm1, %v1194_v23 }
 0x7ac   :  { %1318 = vmatpush1.bf16.msra.mxu1 %v2820_v36  ;;  %1341 = vmatprep.mubr.bf16.mxu1 %v2417_v0 }
 0x7ad   :  { %1319 = vmatprep.subr.bf16.mxu1 %v2824_v37 }
 0x7b0   :  { %1320 = vmatpush1.bf16.msra.mxu1 %v2827_v42 }
 0x7b1   :  { %1321 = vmatprep.subr.bf16.mxu1 %v2830_v46 }
 0x7b4   :  { %1322 = vmatpush1.bf16.msra.mxu1 %v2505_v6 }
 0x7b5   :  { %1323 = vmatprep.subr.bf16.mxu1 %v2507_v7 }
 0x7b8   :  { %1324 = vmatpush1.bf16.msra.mxu1 %v2511_v8 }
 0x7b9   :  { %1460 = vmatprep.subr.bf16.mxu1 %v2535_v34 }
 0x7bb   :  { %2074 = vmatmul.mubr.msk.bf16.vlgmr.msra.gmra.mxu1 %vm178_vm1, %v1194_v23 }
 0x7bc   :  { %1461 = vmatpush1.bf16.msra.mxu1 %v2537_v35  ;;  %1484 = vmatprep.mubr.bf16.mxu1 %v2417_v0 }
 0x7bd   :  { %1462 = vmatprep.subr.bf16.mxu1 %v2546_v38 }
 0x7c0   :  { %1463 = vmatpush1.bf16.msra.mxu1 %v2550_v41 }
 0x7c1   :  { %1464 = vmatprep.subr.bf16.mxu1 %v2555_v44 }
 0x7c4   :  { %1465 = vmatpush1.bf16.msra.mxu1 %v2562_v48 }
 0x7c5   :  { %1466 = vmatprep.subr.bf16.mxu1 %v2569_v51 }
 0x7c8   :  { %1467 = vmatpush1.bf16.msra.mxu1 %v2576_v54 }
 0x7c9   :  { %1626 = vmatprep.subr.bf16.mxu1 %v2531_v31 }
 0x855   :  { %v1276_v6 = vpop.f32.mrf.mxu0 }
 0x857   :  { %v1278_v7 = vpop.f32.mrf.mxu0 }
 0x859   :  { %v1280_v8 = vpop.f32.mrf.mxu0 }
 0x85b   :  { %v1281_v34 = vpop.f32.mrf.mxu0 }
 0x85c   :  { %v2868_v34 = vld [vmem:[#allocation7 + $0x30] ss:$8 sps:$4 sm:$0xff]  }
 0x86b   :  { %v1232_v35 = vpop.f32.mrf.mxu1 }
 0x86c   :  { %v1277_v25 = vadd.f32 %v1276_v6, %v1232_v35  ;;  %v2874_v35 = vld [vmem:[#allocation7 + $0x24] ss:$8 sps:$4 sm:$0xff]  }
 0x86d   :  { %v1234_v26 = vpop.f32.mrf.mxu1 }
 0x86e   :  { %v1283_v38 = vadd.f32 %v1277_v25, %v2622_v14  ;;  %v1279_v41 = vadd.f32 %v1278_v7, %v1234_v26  ;;  %v2878_v25 = vld [vmem:[#allocation7 + $0x20] ss:$8 sps:$4 sm:$0xff]   ;;  %v2884_v26 = vld [vmem:[#allocation7 + $0x10] ss:$8 sps:$4 sm:$0xff]  }
 0x86f   :  { %v1236_v12 = vpop.f32.mrf.mxu1 }
 0x870   :  { %v1285_v44 = vmul.f32 0.5, %v1283_v38  ;;  %v1284_v48 = vadd.f32 %v1279_v41, %v2624_v18 }
 0x871   :  { %v1237_v28 = vpop.f32.mrf.mxu1 }
 0x872   :  { %2214 = vtanh.f32 %v1285_v44  ;;  %v1286_v51 = vmul.f32 0.5, %v1284_v48  ;;  %v2905_v44 = vld [vmem:[#allocation8 + $0x34] ss:$8 sps:$4 sm:$0xff]   ;;  %v2913_v28 = vld [vmem:[#allocation8 + $0x24] ss:$8 sps:$4 sm:$0xff]  }
 0x874   :  { %v1288_v31 = vsel %vm136_vm0, %v1284_v48, %v1286_v51  ;;  %v2909_v48 = vld [vmem:[#allocation8 + $0x30] ss:$8 sps:$4 sm:$0xff]   ;;  %v2916_v51 = vld [vmem:[#allocation8 + $0x20] ss:$8 sps:$4 sm:$0xff]  }
 0x875   :  { %2216 = vtanh.f32 %v1288_v31  ;;  %v2919_v31 = vld [vmem:[#allocation8 + $0x14] ss:$8 sps:$4 sm:$0xff]  }
 0x87b   :  { %v1343_v54 = vpop.f32.mrf.mxu1 }
 0x87d   :  { %v1345_v29 = vpop.f32.mrf.mxu1 }
 0x87e   :  { %v1352_v30 = vcombine.low %v1343_v54, %v1345_v29  ;;  %v2922_v54 = vld [vmem:[#allocation8 + $0x10] ss:$8 sps:$4 sm:$0xff]   ;;  %v2925_v29 = vld [vmem:[#allocation8 + $0x4] ss:$8 sps:$4 sm:$0xff]  }
 0x87f   :  { %v2215_v32 = vpop.eup %2214  ;;  %v1347_v40 = vpop.f32.mrf.mxu1 }
 0x880   :  { %v1359_v43 = vrot.slane %v1352_v30, %v2521_v15  ;;  %v1291_v55 = vmul.f32 0.5, %v2215_v32  ;;  %v2928_v30 = vld [vmem:[#allocation8] ss:$8 sps:$4 sm:$0xff]   ;;  %v2277_v32 = vld [vmem:[#allocation7 + $0x34] ss:$8 sps:$4 sm:$0xff]  }
 0x881   :  { %v1348_v45 = vpop.f32.mrf.mxu1 }
 0x882   :  { %v2217_v47 = vpop.eup %2216  ;;  %v1361_v49 = vadd.f32 %v1359_v43, %v1308_v57  ;;  %v1293_v21 = vadd.f32 0.5, %v1291_v55 }
 0x883   :  { %v1292_v56 = vmul.f32 0.5, %v2217_v47 }
 0x884   :  { %v1362_v58 = vmul.f32 0.5, %v1361_v49  ;;  %v1370_v59 = vrot.slane %v1361_v49, %v2521_v15  ;;  %v1297_v27 = vmul.f32 %v1293_v21, %v2800_v16 }
 0x885   :  { %v1294_v60 = vadd.f32 0.5, %v1292_v56 }
 0x886   :  { %v1381_v11 = vrot.slane %v1362_v58, %v2521_v15  ;;  %v1371_v1 = vcombine.high %v1370_v59, %v1370_v59 }
 0x887   :  { %v1296_v62 = vsel %vm136_vm0, %v2217_v47, %v1294_v60 }
 0x888   :  { %v1382_v2 = vcombine.high %v1381_v11, %v1381_v11  ;;  %v1298_v3 = vmul.f32 %v1296_v62, %v1293_v21  ;;  %2218 = vtanh.f32 %v1381_v11 }
 0x88a   :  { %v1386_v4 = vsel %vm136_vm0, %v1371_v1, %v1382_v2  ;;  %1300 = vrot.lane.b32.xlu0 %v1298_v3, %s2413_s15 }
 0x88b   :  { %2220 = vtanh.f32 %v1386_v4 }
 0x895   :  { %v2219_v5 = vpop.eup %2218 }
 0x896   :  { %v1389_v9 = vmul.f32 0.5, %v2219_v5 }
 0x898   :  { %v2221_v63 = vpop.eup %2220  ;;  %v1391_v17 = vadd.f32 0.5, %v1389_v9 }
 0x899   :  { %v1390_v10 = vmul.f32 0.5, %v2221_v63 }
 0x89a   :  { %v1395_v7 = vmul.f32 %v1391_v17, %v2807_v22  ;;  %v2881_v22 = vld [vmem:[#allocation7 + $0x14] ss:$8 sps:$4 sm:$0xff]  }
 0x89b   :  { %v1392_v13 = vadd.f32 0.5, %v1390_v10 }
 0x89d   :  { %v1394_v19 = vsel %vm136_vm0, %v2221_v63, %v1392_v13  ;;  %v1518_v63 = vld [vmem:[#allocation2 + $0x18] sm:$0xf] }
 0x89e   :  { %v1396_v20 = vmul.f32 %v1394_v19, %v1391_v17 }
 0x8a0   :  { %1398 = vrot.lane.b32.xlu1 %v1396_v20, %s2413_s15 }
 0x8fc   :  { %v1301_v39 = vpop.permute.xlu0 %1300 }
 0x8fd   :  { %v2863_v33 = vadd.f32 %v1301_v39, %v1297_v27 }
 0x8ff   :  { %2222 = vtanh.f32 %v2863_v33 }
 0x90c   :  { %v2223_v61 = vpop.eup %2222 }
 0x90d   :  { %v1305_v23 = vmul.f32 %v2223_v61, %v1296_v62 }
 0x90f   :  { %v1306_v6 = vpack.c.bf16 %v1305_v23, %v1305_v23 }
 0x911   :  { %2076 = vmatmul.mubr.msk.bf16.vlgmr.msra.gmra.mxu1 %vm178_vm1, %v1306_v6 }
 0x912   :  { %v1399_v8 = vpop.permute.xlu1 %1398  ;;  %1627 = vmatpush1.bf16.msra.mxu1 %v2868_v34  ;;  %1650 = vmatprep.mubr.bf16.mxu1 %v2417_v0 }
 0x913   :  { %v2872_v16 = vadd.f32 %v1399_v8, %v1395_v7  ;;  %1628 = vmatprep.subr.bf16.mxu1 %v2874_v35 }
 0x915   :  { %2224 = vtanh.f32 %v2872_v16 }
 0x916   :  { %1629 = vmatpush1.bf16.msra.mxu1 %v2878_v25 }
 0x917   :  { %1630 = vmatprep.subr.bf16.mxu1 %v2881_v22 }
 0x91a   :  { %1631 = vmatpush1.bf16.msra.mxu1 %v2884_v26 }
 0x91b   :  { %1632 = vmatprep.subr.bf16.mxu1 %v2567_v50  ;;  %v2896_v50 = vld [vmem:[#allocation5 + $0x10] ss:$8 sps:$4 sm:$0xff]  }
 0x91e   :  { %1633 = vmatpush1.bf16.msra.mxu1 %v2572_v53  ;;  %v2899_v53 = vld [vmem:[#allocation5 + $0x4] ss:$8 sps:$4 sm:$0xff]  }
 0x91f   :  { %1737 = vmatprep.subr.bf16.mxu1 %v2816_v52  ;;  %v2902_v52 = vld [vmem:[#allocation5] ss:$8 sps:$4 sm:$0xff]  }
 0x922   :  { %v2225_v38 = vpop.eup %2224 }
 0x923   :  { %v1403_v41 = vmul.f32 %v2225_v38, %v1394_v19 }
 0x925   :  { %v1404_v12 = vpack.c.bf16 %v1403_v41, %v1403_v41 }
 0x927   :  { %2075 = vmatmul.mubr.msk.bf16.vlgmr.msra.gmra.mxu0 %vm178_vm1, %v1404_v12 }
 0x928   :  { %1528 = vmatpush1.bf16.msra.mxu0 %v2820_v36  ;;  %1551 = vmatprep.mubr.bf16.mxu0 %v2417_v0 }
 0x929   :  { %1529 = vmatprep.subr.bf16.mxu0 %v2824_v37 }
 0x92c   :  { %1530 = vmatpush1.bf16.msra.mxu0 %v2827_v42 }
 0x92d   :  { %1531 = vmatprep.subr.bf16.mxu0 %v2830_v46 }
 0x930   :  { %1532 = vmatpush1.bf16.msra.mxu0 %v2896_v50 }
 0x931   :  { %1533 = vmatprep.subr.bf16.mxu0 %v2899_v53 }
 0x934   :  { %1534 = vmatpush1.bf16.msra.mxu0 %v2902_v52 }
 0x935   :  { %1670 = vmatprep.subr.bf16.mxu0 %v2905_v44 }
 0x937   :  { %2077 = vmatmul.mubr.msk.bf16.vlgmr.msra.gmra.mxu0 %vm178_vm1, %v1404_v12 }
 0x938   :  { %1671 = vmatpush1.bf16.msra.mxu0 %v2909_v48  ;;  %1694 = vmatprep.mubr.bf16.mxu0 %v2417_v0 }
 0x939   :  { %1672 = vmatprep.subr.bf16.mxu0 %v2913_v28 }
 0x93c   :  { %1673 = vmatpush1.bf16.msra.mxu0 %v2916_v51 }
 0x93d   :  { %1674 = vmatprep.subr.bf16.mxu0 %v2919_v31 }
 0x940   :  { %1675 = vmatpush1.bf16.msra.mxu0 %v2922_v54 }
 0x941   :  { %1676 = vmatprep.subr.bf16.mxu0 %v2925_v29 }
 0x944   :  { %1677 = vmatpush1.bf16.msra.mxu0 %v2928_v30 }
 0x945   :  { %1836 = vmatprep.subr.bf16.mxu0 %v2277_v32 }
 0x9d1   :  { %v1486_v57 = vpop.f32.mrf.mxu1 }
 0x9d3   :  { %v1488_v40 = vpop.f32.mrf.mxu1 }
 0x9d5   :  { %v1490_v43 = vpop.f32.mrf.mxu1 }
 0x9d7   :  { %v1491_v45 = vpop.f32.mrf.mxu1 }
 0x9e7   :  { %v1442_v47 = vpop.f32.mrf.mxu0 }
 0x9e8   :  { %v1487_v49 = vadd.f32 %v1486_v57, %v1442_v47 }
 0x9e9   :  { %v1444_v55 = vpop.f32.mrf.mxu0 }
 0x9ea   :  { %v1493_v56 = vadd.f32 %v1487_v49, %v2622_v14  ;;  %v1489_v58 = vadd.f32 %v1488_v40, %v1444_v55 }
 0x9eb   :  { %v1446_v59 = vpop.f32.mrf.mxu0 }
 0x9ec   :  { %v1495_v60 = vmul.f32 0.5, %v1493_v56  ;;  %v1494_v11 = vadd.f32 %v1489_v58, %v2624_v18 }
 0x9ed   :  { %v1447_v21 = vpop.f32.mrf.mxu0 }
 0x9ee   :  { %2226 = vtanh.f32 %v1495_v60  ;;  %v1496_v62 = vmul.f32 0.5, %v1494_v11 }
 0x9f0   :  { %v1498_v1 = vsel %vm136_vm0, %v1494_v11, %v1496_v62 }
 0x9f1   :  { %2228 = vtanh.f32 %v1498_v1 }
 0x9f7   :  { %v1553_v2 = vpop.f32.mrf.mxu0 }
 0x9f9   :  { %v1555_v3 = vpop.f32.mrf.mxu0 }
 0x9fa   :  { %v1562_v4 = vcombine.low %v1553_v2, %v1555_v3 }
 0x9fb   :  { %v2227_v5 = vpop.eup %2226  ;;  %v1557_v9 = vpop.f32.mrf.mxu0 }
 0x9fc   :  { %v1569_v10 = vrot.slane %v1562_v4, %v2521_v15  ;;  %v1501_v20 = vmul.f32 0.5, %v2227_v5 }
 0x9fd   :  { %v1558_v13 = vpop.f32.mrf.mxu0 }
 0x9fe   :  { %v2229_v17 = vpop.eup %2228  ;;  %v1571_v19 = vadd.f32 %v1569_v10, %v1518_v63  ;;  %v1503_v7 = vadd.f32 0.5, %v1501_v20 }
 0x9ff   :  { %v1502_v27 = vmul.f32 0.5, %v2229_v17 }
 0xa00   :  { %v1572_v39 = vmul.f32 0.5, %v1571_v19  ;;  %v1580_v61 = vrot.slane %v1571_v19, %v2521_v15  ;;  %v1507_v58 = vmul.f32 %v1503_v7, %v2863_v33  ;;  %v2278_v33 = vld [vmem:[#allocation7 + $0x4] ss:$8 sps:$4 sm:$0xff]  }
 0xa01   :  { %v1504_v23 = vadd.f32 0.5, %v1502_v27 }
 0xa02   :  { %v1591_v6 = vrot.slane %v1572_v39, %v2521_v15  ;;  %v1581_v38 = vcombine.high %v1580_v61, %v1580_v61 }
 0xa03   :  { %v1506_v8 = vsel %vm136_vm0, %v2229_v17, %v1504_v23 }
 0xa04   :  { %v1592_v41 = vcombine.high %v1591_v6, %v1591_v6  ;;  %v1508_v12 = vmul.f32 %v1506_v8, %v1503_v7  ;;  %2230 = vtanh.f32 %v1591_v6 }
 0xa06   :  { %v1596_v32 = vsel %vm136_vm0, %v1581_v38, %v1592_v41  ;;  %1510 = vrot.lane.b32.xlu0 %v1508_v12, %s2413_s15 }
 0xa07   :  { %2232 = vtanh.f32 %v1596_v32 }
 0xa11   :  { %v2231_v57 = vpop.eup %2230 }
 0xa12   :  { %v1599_v43 = vmul.f32 0.5, %v2231_v57 }
 0xa14   :  { %v2233_v40 = vpop.eup %2232  ;;  %v1601_v49 = vadd.f32 0.5, %v1599_v43 }
 0xa15   :  { %v1600_v45 = vmul.f32 0.5, %v2233_v40 }
 0xa16   :  { %v1605_v1 = vmul.f32 %v1601_v49, %v2872_v16  ;;  %v2279_v16 = vld [vmem:[#allocation7] ss:$8 sps:$4 sm:$0xff]  }
 0xa17   :  { %v1602_v47 = vadd.f32 0.5, %v1600_v45 }
 0xa19   :  { %v1604_v55 = vsel %vm136_vm0, %v2233_v40, %v1602_v47 }
 0xa1a   :  { %v1606_v56 = vmul.f32 %v1604_v55, %v1601_v49 }
 0xa1c   :  { %1608 = vrot.lane.b32.xlu1 %v1606_v56, %s2413_s15 }
 0xa78   :  { %v1511_v59 = vpop.permute.xlu0 %1510 }
 0xa79   :  { %v2947_v60 = vadd.f32 %v1511_v59, %v1507_v58 }
 0xa7b   :  { %2234 = vtanh.f32 %v2947_v60 }
 0xa88   :  { %v2235_v11 = vpop.eup %2234 }
 0xa89   :  { %v1515_v21 = vmul.f32 %v2235_v11, %v1506_v8 }
 0xa8b   :  { %v1516_v62 = vpack.c.bf16 %v1515_v21, %v1515_v21 }
 0xa8d   :  { %2079 = vmatmul.mubr.msk.bf16.vlgmr.msra.gmra.mxu0 %vm178_vm1, %v1516_v62 }
 0xa8e   :  { %v1609_v2 = vpop.permute.xlu1 %1608  ;;  %1837 = vmatpush1.bf16.msra.mxu0 %v2868_v34  ;;  %1860 = vmatprep.mubr.bf16.mxu0 %v2417_v0 }
 0xa8f   :  { %v2954_v3 = vadd.f32 %v1609_v2, %v1605_v1  ;;  %1838 = vmatprep.subr.bf16.mxu0 %v2874_v35 }
 0xa91   :  { %2236 = vtanh.f32 %v2954_v3 }
 0xa92   :  { %1839 = vmatpush1.bf16.msra.mxu0 %v2878_v25 }
 0xa93   :  { %1840 = vmatprep.subr.bf16.mxu0 %v2881_v22 }
 0xa96   :  { %1841 = vmatpush1.bf16.msra.mxu0 %v2884_v26 }
 0xa97   :  { %1842 = vmatprep.subr.bf16.mxu0 %v2278_v33 }
 0xa9a   :  { %1843 = vmatpush1.bf16.msra.mxu0 %v2279_v16 }
 0xa9e   :  { %v2237_v4 = vpop.eup %2236 }
 0xa9f   :  { %v1613_v34 = vmul.f32 %v2237_v4, %v1604_v55 }
 0xaa1   :  { %v1614_v5 = vpack.c.bf16 %v1613_v34, %v1613_v34 }
 0xaa3   :  { %2078 = vmatmul.mubr.msk.bf16.vlgmr.msra.gmra.mxu1 %vm178_vm1, %v1614_v5 }
 0xaa4   :  { %1738 = vmatpush1.bf16.msra.mxu1 %v2820_v36  ;;  %1761 = vmatprep.mubr.bf16.mxu1 %v2417_v0 }
 0xaa5   :  { %1739 = vmatprep.subr.bf16.mxu1 %v2824_v37 }
 0xaa8   :  { %1740 = vmatpush1.bf16.msra.mxu1 %v2827_v42 }
 0xaa9   :  { %1741 = vmatprep.subr.bf16.mxu1 %v2830_v46 }
 0xaac   :  { %1742 = vmatpush1.bf16.msra.mxu1 %v2896_v50 }
 0xaad   :  { %1743 = vmatprep.subr.bf16.mxu1 %v2899_v53 }
 0xab0   :  { %1744 = vmatpush1.bf16.msra.mxu1 %v2902_v52 }
 0xab1   :  { %1880 = vmatprep.subr.bf16.mxu1 %v2905_v44 }
 0xab3   :  { %2080 = vmatmul.mubr.msk.bf16.vlgmr.msra.gmra.mxu1 %vm178_vm1, %v1614_v5 }
 0xab4   :  { %1881 = vmatpush1.bf16.msra.mxu1 %v2909_v48  ;;  %1904 = vmatprep.mubr.bf16.mxu1 %v2417_v0 }
 0xab5   :  { %1882 = vmatprep.subr.bf16.mxu1 %v2913_v28 }
 0xab8   :  { %1883 = vmatpush1.bf16.msra.mxu1 %v2916_v51 }
 0xab9   :  { %1884 = vmatprep.subr.bf16.mxu1 %v2919_v31 }
 0xabc   :  { %1885 = vmatpush1.bf16.msra.mxu1 %v2922_v54 }
 0xabd   :  { %1886 = vmatprep.subr.bf16.mxu1 %v2925_v29 }
 0xac0   :  { %1887 = vmatpush1.bf16.msra.mxu1 %v2928_v30  ;;  %v1728_v30 = vld [vmem:[#allocation2 + $0x1c] sm:$0xf] }
 0xb4d   :  { %v1696_v36 = vpop.f32.mrf.mxu0 }
 0xb4f   :  { %v1698_v37 = vpop.f32.mrf.mxu0 }
 0xb51   :  { %v1700_v42 = vpop.f32.mrf.mxu0 }
 0xb53   :  { %v1701_v46 = vpop.f32.mrf.mxu0 }
 0xb63   :  { %v1652_v35 = vpop.f32.mrf.mxu1 }
 0xb64   :  { %v1697_v25 = vadd.f32 %v1696_v36, %v1652_v35 }
 0xb65   :  { %v1654_v22 = vpop.f32.mrf.mxu1 }
 0xb66   :  { %v1703_v0 = vadd.f32 %v1697_v25, %v2622_v14  ;;  %v1699_v26 = vadd.f32 %v1698_v37, %v1654_v22 }
 0xb67   :  { %v1656_v50 = vpop.f32.mrf.mxu1 }
 0xb68   :  { %v1705_v53 = vmul.f32 0.5, %v1703_v0  ;;  %v1704_v52 = vadd.f32 %v1699_v26, %v2624_v18 }
 0xb69   :  { %v1657_v44 = vpop.f32.mrf.mxu1 }
 0xb6a   :  { %2238 = vtanh.f32 %v1705_v53  ;;  %v1706_v48 = vmul.f32 0.5, %v1704_v52  ;;  %v2156_v44 = vld [vmem:[#allocation10 + $0x18] sm:$0xff]  }
 0xb6c   :  { %v1708_v28 = vsel %vm136_vm0, %v1704_v52, %v1706_v48  ;;  %v2419_v48 = vmov 0.0  }
 0xb6d   :  { %2240 = vtanh.f32 %v1708_v28  ;;  %2094 = vmatprep.subr.bf16.mxu0 %v2419_v48 }
 0xb73   :  { %v1763_v51 = vpop.f32.mrf.mxu1 }
 0xb75   :  { %v1765_v31 = vpop.f32.mrf.mxu1 }
 0xb76   :  { %v1772_v54 = vcombine.low %v1763_v51, %v1765_v31 }
 0xb77   :  { %v2239_v29 = vpop.eup %2238  ;;  %v1767_v63 = vpop.f32.mrf.mxu1 }
 0xb78   :  { %v1779_v9 = vrot.slane %v1772_v54, %v2521_v15  ;;  %v1711_v19 = vmul.f32 0.5, %v2239_v29  ;;  %v2158_v54 = vld [vmem:[#allocation10 + $0x8] sm:$0xff]  }
 0xb79   :  { %v1768_v10 = vpop.f32.mrf.mxu1 }
 0xb7a   :  { %v2241_v13 = vpop.eup %2240  ;;  %v1781_v17 = vadd.f32 %v1779_v9, %v1728_v30  ;;  %v1713_v6 = vadd.f32 0.5, %v1711_v19  ;;  %v2159_v9 = vld [vmem:[#allocation10] sm:$0xff]  }
 0xb7b   :  { %v1712_v20 = vmul.f32 0.5, %v2241_v13 }
 0xb7c   :  { %v1782_v27 = vmul.f32 0.5, %v1781_v17  ;;  %v1790_v39 = vrot.slane %v1781_v17, %v2521_v15  ;;  %v1717_v55 = vmul.f32 %v1713_v6, %v2947_v60 }
 0xb7d   :  { %v1714_v61 = vadd.f32 0.5, %v1712_v20 }
 0xb7e   :  { %v1801_v23 = vrot.slane %v1782_v27, %v2521_v15  ;;  %v1791_v8 = vcombine.high %v1790_v39, %v1790_v39 }
 0xb7f   :  { %v1716_v7 = vsel %vm136_vm0, %v2241_v13, %v1714_v61 }
 0xb80   :  { %v1802_v38 = vcombine.high %v1801_v23, %v1801_v23  ;;  %v1718_v41 = vmul.f32 %v1716_v7, %v1713_v6  ;;  %2242 = vtanh.f32 %v1801_v23 }
 0xb82   :  { %v1806_v12 = vsel %vm136_vm0, %v1791_v8, %v1802_v38  ;;  %1720 = vrot.lane.b32.xlu1 %v1718_v41, %s2413_s15 }
 0xb83   :  { %2244 = vtanh.f32 %v1806_v12 }
 0xb8d   :  { %v2243_v32 = vpop.eup %2242 }
 0xb8e   :  { %v1809_v40 = vmul.f32 0.5, %v2243_v32 }
 0xb90   :  { %v2245_v57 = vpop.eup %2244  ;;  %v1811_v15 = vadd.f32 0.5, %v1809_v40 }
 0xb91   :  { %v1810_v43 = vmul.f32 0.5, %v2245_v57 }
 0xb92   :  { %v1815_v62 = vmul.f32 %v1811_v15, %v2954_v3 }
 0xb93   :  { %v1812_v45 = vadd.f32 0.5, %v1810_v43 }
 0xb95   :  { %v1814_v47 = vsel %vm136_vm0, %v2245_v57, %v1812_v45 }
 0xb96   :  { %v1816_v49 = vmul.f32 %v1814_v47, %v1811_v15 }
 0xb98   :  { %1818 = vrot.lane.b32.xlu0 %v1816_v49, %s2413_s15 }
 0xbf4   :  { %v1721_v56 = vpop.permute.xlu1 %1720 }
 0xbf5   :  { %v1723_v58 = vadd.f32 %v1721_v56, %v1717_v55 }
 0xbf7   :  { %2246 = vtanh.f32 %v1723_v58 }
 0xc04   :  { %v2247_v59 = vpop.eup %2246 }
 0xc05   :  { %v1725_v11 = vmul.f32 %v2247_v59, %v1716_v7 }
 0xc07   :  { %v1726_v21 = vpack.c.bf16 %v1725_v11, %v1725_v11 }
 0xc09   :  { %2082 = vmatmul.mubr.msk.bf16.vlgmr.msra.gmra.mxu1 %vm178_vm1, %v1726_v21 }
 0xc0a   :  { %v1819_v1 = vpop.permute.xlu0 %1818 }
 0xc0b   :  { %v1821_v2 = vadd.f32 %v1819_v1, %v1815_v62 }
 0xc0d   :  { %2248 = vtanh.f32 %v1821_v2 }
 0xc1a   :  { %v2249_v33 = vpop.eup %2248 }
 0xc1b   :  { %v1823_v16 = vmul.f32 %v2249_v33, %v1814_v47 }
 0xc1d   :  { %v1824_v4 = vpack.c.bf16 %v1823_v16, %v1823_v16 }
 0xc1f   :  { %2081 = vmatmul.mubr.msk.bf16.vlgmr.msra.gmra.mxu0 %vm178_vm1, %v1824_v4 }
 0xc20   :  { %2102 = vmatprep.mubr.msk.bf16.mxu0 %vm2420_vm2, %v2419_v48  ;;  %2095 = vmatpush3.bf16.msra.mxu0 %v2156_v44 }
 0xc21   :  { %2096 = vmatprep.subr.bf16.mxu0 %v2419_v48 }
 0xcc9   :  { %v1906_v34 = vpop.f32.mrf.mxu1 }
 0xccb   :  { %v1908_v60 = vpop.f32.mrf.mxu1 }
 0xccd   :  { %v1910_v5 = vpop.f32.mrf.mxu1 }
 0xccf   :  { %v1911_v36 = vpop.f32.mrf.mxu1 }
 0xcdf   :  { %v1862_v37 = vpop.f32.mrf.mxu0 }
 0xce0   :  { %v1907_v42 = vadd.f32 %v1906_v34, %v1862_v37 }
 0xce1   :  { %v1864_v46 = vpop.f32.mrf.mxu0 }
 0xce2   :  { %v1913_v35 = vadd.f32 %v1907_v42, %v2622_v14  ;;  %v1909_v3 = vadd.f32 %v1908_v60, %v1864_v46  ;;  %v2157_v14 = vld [vmem:[#allocation10 + $0x10] sm:$0xff]  }
 0xce3   :  { %v1866_v25 = vpop.f32.mrf.mxu0  ;;  %2097 = vmatpush3.bf16.msra.mxu0 %v2157_v14 }
 0xce4   :  { %v1915_v22 = vmul.f32 0.5, %v1913_v35  ;;  %v1914_v0 = vadd.f32 %v1909_v3, %v2624_v18  ;;  %2098 = vmatprep.subr.bf16.mxu0 %v2419_v48 }
 0xce5   :  { %v1867_v26 = vpop.f32.mrf.mxu0 }
 0xce6   :  { %2250 = vtanh.f32 %v1915_v22  ;;  %v1916_v50 = vmul.f32 0.5, %v1914_v0 }
 0xce7   :  { %2099 = vmatpush3.bf16.msra.mxu0 %v2158_v54 }
 0xce8   :  { %v1918_v53 = vsel %vm136_vm0, %v1914_v0, %v1916_v50  ;;  %2100 = vmatprep.subr.bf16.mxu0 %v2419_v48 }
 0xce9   :  { %2252 = vtanh.f32 %v1918_v53 }
 0xceb   :  { %2101 = vmatpush3.bf16.msra.mxu0 %v2159_v9 }
 0xcf3   :  { %v2251_v52 = vpop.eup %2250 }
 0xcf4   :  { %v1921_v51 = vmul.f32 0.5, %v2251_v52 }
 0xcf6   :  { %v2253_v28 = vpop.eup %2252  ;;  %v1923_v29 = vadd.f32 0.5, %v1921_v51 }
 0xcf7   :  { %v1922_v31 = vmul.f32 0.5, %v2253_v28 }
 0xcf8   :  { %v1927_v10 = vmul.f32 %v1923_v29, %v1723_v58 }
 0xcf9   :  { %v1924_v18 = vadd.f32 0.5, %v1922_v31 }
 0xcfb   :  { %v1926_v30 = vsel %vm136_vm0, %v2253_v28, %v1924_v18 }
 0xcfc   :  { %v1928_v63 = vmul.f32 %v1926_v30, %v1923_v29 }
 0xcfe   :  { %1930 = vrot.lane.b32.xlu1 %v1928_v63, %s2413_s15 }
 0xd70   :  { %v1931_v13 = vpop.permute.xlu1 %1930 }
 0xd71   :  { %v1933_v17 = vadd.f32 %v1931_v13, %v1927_v10 }
 0xd73   :  { %2254 = vtanh.f32 %v1933_v17 }
 0xd80   :  { %v2255_v19 = vpop.eup %2254 }
 0xd81   :  { %v1935_v20 = vmul.f32 %v2255_v19, %v1926_v30 }
 0xd83   :  { %v1936_v27 = vpack.c.bf16 %v1935_v20, %v1935_v20 }
 0xd85   :  { %2103 = vmatmul.mubr.msk.bf16.vlgmr.msra.gmra.mxu0 %vm178_vm1, %v1936_v27 }
 0xe45   :  { %v2013_v39 = vpop.f32.mrf.mxu0 }
 0xe46   :  { %v2014_v61 = vadd.f32 %v2083_v24, %v2013_v39 }
 0xe47   :  { %v2104_v23 = vpop.f32.mrf.mxu0 }
 0xe48   :  { %2019 = vst [vmem:[#allocation11] sm:$0x3] %v2014_v61 }
 0xe49   :  { %v2016_v6 = vpop.f32.mrf.mxu0 }
 0xe4a   :  { %2391 = shalt.err (!%p2388_p1)
}
 0xe4b   :  { %2029 = dma.vmem_to_hbm [thread:$0]  %s2027_s29, 32, %s3020_s7, [#allocation4]   ;;  %v2105_v7 = vpop.f32.mrf.mxu0 }
 0xe4c   :  { %2406 = dma.done.wait [#allocation4], 32  }
 0xe4d   :  { %2407 = vsyncadd [#allocation4], 4294967264 }
 0xe4e   :  { %2033 = vsyncpa [#allocation3], 1 }
 0xe4f   :  { %2034 = vsyncpa [#allocation6], 1 }
 0xe50   :  { %2035 = vsyncpa [#allocation9], 1 }
 0xe51   :  { %2036 = vsyncpa [#allocation4], 1 }

</bundles_post_ra>
